<compile_context>
chip_gen: v6e
topology: v6e:2x2x1
jax: 0.10.0
libtpu: 0.0.40
codegen_flags: <defaults>
</compile_context>

<pallas_src>
import functools
import numpy as np

import jax
import jax.numpy as jnp
from jax import lax
from jax.experimental import pallas as pl
from jax.experimental.pallas import tpu as pltpu

CPAD = 128  # lane-dense channel padding for every activation / weight


# --------------------------------------------------------------------------
# Skeleton topology helpers (pure python; mirrors the PyTorch module __init__)
# --------------------------------------------------------------------------
def calc_edge_mat(edges):
    edge_num = len(edges)
    edge_mat = [[100000] * edge_num for _ in range(edge_num)]
    for i in range(edge_num):
        edge_mat[i][i] = 0
    for i, a in enumerate(edges):
        for j, b in enumerate(edges):
            link = 0
            for x in range(2):
                for y in range(2):
                    if a[x] == b[y]:
                        link = 1
            if link:
                edge_mat[i][j] = 1
    for k in range(edge_num):
        for i in range(edge_num):
            for j in range(edge_num):
                edge_mat[i][j] = min(edge_mat[i][j], edge_mat[i][k] + edge_mat[k][j])
    return edge_mat


def find_neighbor(edges, d):
    distance_mat = calc_edge_mat(edges)
    edge_num = len(distance_mat)
    neighbor_list = []
    for i in range(edge_num):
        neighbor_list.append([j for j in range(edge_num) if distance_mat[i][j] <= d])
    global_part_neighbor = neighbor_list[0].copy()
    for i in global_part_neighbor:          # (keeps the original repo's known quirk)
        neighbor_list[i].append(edge_num)
    global_part_neighbor.append(edge_num)
    neighbor_list.append(global_part_neighbor)
    return neighbor_list


def build_pooling(edges, last_pool):
    """Mirrors SkeletonPool topology logic (pooling_mode='mean')."""
    edge_num = len(edges) + 1
    seq_list, pooling_list, new_edges = [], [], []
    degree = [0] * 100
    for edge in edges:
        degree[edge[0]] += 1
        degree[edge[1]] += 1

    def find_seq(j, seq):
        if degree[j] > 2 and j != 0:
            seq_list.append(seq)
            seq = []
        if degree[j] == 1:
            seq_list.append(seq)
            return
        for idx, edge in enumerate(edges):
            if edge[0] == j:
                find_seq(edge[1], seq + [idx])

    find_seq(0, [])
    for seq in seq_list:
        if last_pool:
            pooling_list.append(seq)
            continue
        if len(seq) % 2 == 1:
            pooling_list.append([seq[0]])
            new_edges.append(edges[seq[0]])
            seq = seq[1:]
        for i in range(0, len(seq), 2):
            pooling_list.append([seq[i], seq[i + 1]])
            new_edges.append([edges[seq[i]][0], edges[seq[i + 1]][1]])
    pooling_list.append([edge_num - 1])
    return pooling_list, new_edges


def pool_weight(pooling_list, edge_num, cpe):
    w = np.zeros((len(pooling_list) * cpe, edge_num * cpe), dtype=np.float32)
    for i, pair in enumerate(pooling_list):
        for j in pair:
            for c in range(cpe):
                w[i * cpe + c, j * cpe + c] = 1.0 / len(pair)
    return w


def unpool_weight(pooling_list, cpe):
    in_edge = len(pooling_list)
    out_edge = sum(len(t) for t in pooling_list)
    w = np.zeros((out_edge * cpe, in_edge * cpe), dtype=np.float32)
    for i, pair in enumerate(pooling_list):
        for j in pair:
            for c in range(cpe):
                w[j * cpe + c, i * cpe + c] = 1.0
    return w


def _conv_mask(neighbor_list, in_cpj, out_cpj, K):
    J = len(neighbor_list)
    m = np.zeros((out_cpj * J, in_cpj * J, K), np.float32)
    for i, nb in enumerate(neighbor_list):
        cols = [k * in_cpj + c for k in nb for c in range(in_cpj)]
        m[out_cpj * i: out_cpj * (i + 1), cols, :] = 1.0
    return m


def _linear_mask(neighbor_list, in_cpj, out_cpj):
    J = len(neighbor_list)
    m = np.zeros((out_cpj * J, in_cpj * J), np.float32)
    for i, nb in enumerate(neighbor_list):
        cols = [k * in_cpj + c for k in nb for c in range(in_cpj)]
        m[out_cpj * i: out_cpj * (i + 1), cols] = 1.0
    return m


# --------------------------------------------------------------------------
# Lane-dense parameter packing helpers (pad channel axes to 128 ONCE at setup)
# --------------------------------------------------------------------------
def _pad_to(a, rows, cols):
    a = np.asarray(a, np.float32)
    out = np.zeros((rows, cols), np.float32)
    out[: a.shape[0], : a.shape[1]] = a
    return out


def _pack_w(blocks):
    """blocks: K arrays (C_in_eff, C_out_eff) -> (K*CPAD, CPAD) bf16 (MXU operand)."""
    stacked = np.concatenate([_pad_to(b, CPAD, CPAD) for b in blocks], axis=0)
    return jnp.asarray(stacked).astype(jnp.bfloat16)


def _pack_mat(a):
    return jnp.asarray(_pad_to(a, CPAD, CPAD))


def _pack_row(v):
    return jnp.asarray(_pad_to(np.asarray(v, np.float32)[None, :], 1, CPAD))


# --------------------------------------------------------------------------
# Time-selection matrices: reflect pad + stride decimation + (linear x2
# upsample) + per-batch blocking, precomputed as tiny constant matrices so the
# in-kernel "gather" is just a lane-dense MXU dot.
# --------------------------------------------------------------------------
def _reflect_idx(p, n):
    if p < 0:
        return -p
    if p >= n:
        return 2 * (n - 1) - p
    return p


def _upsample_matrix(T):
    """nn.Upsample(scale_factor=2, mode='linear', align_corners=False) as (2T, T)."""
    U = np.zeros((2 * T, T), np.float32)
    for j in range(2 * T):
        s = max((j + 0.5) * 0.5 - 0.5, 0.0)
        i0 = int(np.floor(s))
        i1 = min(i0 + 1, T - 1)
        lam = s - i0
        U[j, i0] += 1.0 - lam
        U[j, i1] += lam
    return U


def _conv_select(B, T_in, T_out, K, stride, padding, upsample):
    """(K*B*T_out, B*T_in) stacked selection/interpolation matrices G_k."""
    if upsample:
        U = _upsample_matrix(T_in)
        T_run = 2 * T_in
    else:
        U = np.eye(T_in, dtype=np.float32)
        T_run = T_in
    G = np.zeros((K, B * T_out, B * T_in), np.float32)
    for k in range(K):
        for t in range(T_out):
            p = _reflect_idx(t * stride + k - padding, T_run)
            for b in range(B):
                G[k, b * T_out + t, b * T_in:(b + 1) * T_in] = U[p]
    return jnp.asarray(G.reshape(K * B * T_out, B * T_in))


# --------------------------------------------------------------------------
# The single fused AE kernel: all encoder + decoder layers in one body.
# Per layer: tap gather (G dots) -> one big conv dot -> bias + offset linear ->
# [training-mode BatchNorm1d + SkeletonPool dot] -> LeakyReLU.
# --------------------------------------------------------------------------
def build_ae_kernel(layer_meta, *, B, K, eps=1e-5):
    n_in = 1 + sum(9 if m['has_bn'] else 6 for m in layer_meta)

    def kernel(*refs):
        in_refs = refs[:n_in]
        latent_ref = refs[n_in]
        result_ref = refs[n_in + 1]

        pos = 0
        x_ref = in_refs[pos]
        pos += 1
        h = x_ref[...]                                          # (B*T0, 128) f32

        for m in layer_meta:
            G_ref, w_ref, b_ref, offw_ref, offb_ref, off_ref = in_refs[pos:pos + 6]
            pos += 6
            if m['has_bn']:
                gamma_ref, beta_ref, pool_ref = in_refs[pos:pos + 3]
                pos += 3

            T_out = m['T_out']
            M = B * T_out

            # K-tap gather: reflect pad / stride / upsample / batch-blocking are
            # all folded into G; each tap is one lane-dense dot.
            taps = [jnp.dot(G_ref[k * M:(k + 1) * M, :], h,
                            preferred_element_type=jnp.float32)
                    for k in range(K)]
            # ONE conv contraction against the pre-concatenated (K*128, 128) weight.
            tap = jnp.concatenate(taps, axis=-1).astype(jnp.bfloat16)
            y = jnp.dot(tap, w_ref[...], preferred_element_type=jnp.float32)

            # Fused offset SkeletonLinear (res / 100 in the torch code).
            off_res = (jnp.dot(off_ref[...], offw_ref[...],
                               preferred_element_type=jnp.float32)
                       + offb_ref[...]) * 0.01                   # (B, 128)
            row = lax.broadcasted_iota(jnp.int32, (M, CPAD), 0)
            off_full = jnp.zeros((M, CPAD), jnp.float32)
            for b in range(B):                                   # tiny static loop
                sel = jnp.logical_and(row >= b * T_out, row < (b + 1) * T_out)
                off_full = jnp.where(
                    sel, jnp.broadcast_to(off_res[b:b + 1, :], (M, CPAD)), off_full)
            y = y + b_ref[...] + off_full

            if m['has_bn']:
                # torch training-mode BatchNorm1d: biased batch stats, single pass.
                inv_n = 1.0 / float(M)
                mu = jnp.sum(y, axis=0, keepdims=True) * inv_n
                ms = jnp.sum(y * y, axis=0, keepdims=True) * inv_n
                var = ms - mu * mu
                y = (y - mu) * lax.rsqrt(var + eps) * gamma_ref[...] + beta_ref[...]
                # SkeletonPool (cannot be folded into the conv weight across BN).
                y = jnp.dot(y.astype(jnp.bfloat16), pool_ref[...],
                            preferred_element_type=jnp.float32)

            if m['alpha'] != 1.0:                                # trace-time skip
                y = jnp.where(y >= 0, y, m['alpha'] * y)

            if m['emit_latent']:
                latent_ref[...] = y
            h = y

        result_ref[...] = h

    return kernel


# --------------------------------------------------------------------------
# AE forward: boundary glue (transpose / channel pad / final slice) + one
# pallas_call over the whole network.
# --------------------------------------------------------------------------
def ae_forward(packed, x, offsets, *, num_layers, padding, K, c_latent, c_out):
    B, C_in, T = x.shape
    f32 = jnp.float32

    xt = jnp.transpose(x, (0, 2, 1)).reshape(B * T, C_in)
    x_slab = jnp.pad(xt.astype(f32), ((0, 0), (0, CPAD - C_in)))

    offs_pad = []
    for off in offsets:
        of = off.reshape(B, -1).astype(f32)
        offs_pad.append(jnp.pad(of, ((0, 0), (0, CPAD - of.shape[1]))))

    # Static per-layer schedule (trace time).
    metas = []
    T_cur = T
    for i in range(num_layers):
        T_out = (T_cur + 2 * padding - K) // 2 + 1
        metas.append(dict(T_in=T_cur, T_out=T_out, stride=2, upsample=False,
                          has_bn=(i < num_layers - 1), alpha=0.2,
                          emit_latent=(i == num_layers - 1),
                          off_idx=i, params=packed['enc'][i]))
        T_cur = T_out
    T_lat = T_cur
    for i in range(num_layers):
        T_out = 2 * T_cur           # upsample x2 then stride-1 "same" conv
        metas.append(dict(T_in=T_cur, T_out=T_out, stride=1, upsample=True,
                          has_bn=False, alpha=(0.2 if i != num_layers - 1 else 1.0),
                          emit_latent=False,
                          off_idx=num_layers - 1 - i, params=packed['dec'][i]))
        T_cur = T_out
    T_res = T_cur

    inputs = [x_slab]
    for m in metas:
        G = _conv_select(B, m['T_in'], m['T_out'], K, m['stride'], padding,
                         m['upsample'])
        p = m['params']
        inputs.extend([G, p['w'], p['b'], p['offw'], p['offb'],
                       offs_pad[m['off_idx']]])
        if m['has_bn']:
            inputs.extend([p['gamma'], p['beta'], p['pool_t']])

    static_meta = [dict(T_out=m['T_out'], has_bn=m['has_bn'], alpha=m['alpha'],
                        emit_latent=m['emit_latent']) for m in metas]
    kernel = build_ae_kernel(static_meta, B=B, K=K)

    vmem = pl.BlockSpec(memory_space=pltpu.MemorySpace.VMEM)
    # TODO(synk): for non-toy B*T, split back into per-layer pallas_calls with an
    # M-grid (dimension_semantics=("parallel",)) and re-derive the tile budget for
    # v7x's 64 MiB VMEM; at these shapes the whole net fits in VMEM trivially.
    latent_slab, result_slab = pl.pallas_call(
        kernel,
        out_shape=(jax.ShapeDtypeStruct((B * T_lat, CPAD), f32),
                   jax.ShapeDtypeStruct((B * T_res, CPAD), f32)),
        in_specs=[vmem] * len(inputs),
        out_specs=(vmem, vmem),
    )(*inputs)

    latent = latent_slab.reshape(B, T_lat, CPAD)[:, :, :c_latent].transpose(0, 2, 1)
    result = result_slab.reshape(B, T_res, CPAD)[:, :, :c_out].transpose(0, 2, 1)
    # channel_base[0] == 3, so no channel-trim branch.
    return latent, result


# --------------------------------------------------------------------------
# Parameter construction: masked once, pool / unpool pre-composed, padded to
# 128 lanes, conv weights pre-cast to bf16.  Also keeps "raw" params for the
# pure-JAX reference.
# --------------------------------------------------------------------------
class Args:
    kernel_size = 3
    num_layers = 2
    skeleton_dist = 2
    padding_mode = 'reflection'
    skeleton_pool = 'mean'
    upsampling = 'linear'


def make_ae_params(key, args, topology, typeofchannel=3):
    keys = iter(jax.random.split(key, 64))

    def rnd(shape, scale=0.1):
        return np.asarray(scale * jax.random.normal(next(keys), shape,
                                                    dtype=jnp.float32))

    K = args.kernel_size
    L = args.num_layers
    channel_base = [typeofchannel]
    for _ in range(L):
        channel_base.append(channel_base[-1] * 2)

    topologies = [list(topology)]
    edge_num = [len(topology) + 1]
    pooling_lists = []
    channel_list = []

    raw_enc, packed_enc = [], []
    for i in range(L):
        neighbor_list = find_neighbor(topologies[i], args.skeleton_dist)
        in_channels = channel_base[i] * edge_num[i]
        out_channels = channel_base[i + 1] * edge_num[i]
        if i == 0:
            channel_list.append(in_channels)
        channel_list.append(out_channels)
        in_cpj = in_channels // edge_num[i]
        out_cpj = out_channels // edge_num[i]
        in_off = 3 * channel_base[i] // channel_base[0]

        mask = _conv_mask(neighbor_list, in_cpj, out_cpj, K)
        off_mask = _linear_mask(neighbor_list, in_off, out_cpj)
        W = rnd((out_channels, in_channels, K)) * mask                 # pre-masked
        bvec = rnd((out_channels,))
        offW = rnd((out_channels, in_off * edge_num[i])) * off_mask    # pre-masked
        offb = rnd((out_channels,))

        last_pool = (i == L - 1)
        pooling_list, new_edges = build_pooling(topologies[i], last_pool)
        cpe = out_channels // len(neighbor_list)
        pw = pool_weight(pooling_list, edge_num[i], cpe)               # (C_pool, C_out)
        has_bn = (i < L - 1)
        gamma = np.ones((out_channels,), np.float32)
        beta = np.zeros((out_channels,), np.float32)

        raw_enc.append(dict(W=jnp.asarray(W), b=jnp.asarray(bvec),
                            offW=jnp.asarray(offW), offb=jnp.asarray(offb),
                            pool=jnp.asarray(pw), bn=has_bn,
                            gamma=jnp.asarray(gamma), beta=jnp.asarray(beta)))

        if has_bn:
            # BN sits between conv and pool -> pool applied in-kernel.
            packed_enc.append(dict(
                w=_pack_w([W[:, :, k].T for k in range(K)]),
                b=_pack_row(bvec),
                offw=_pack_mat(offW.T),
                offb=_pack_row(offb),
                gamma=_pack_row(gamma),
                beta=_pack_row(beta),
                pool_t=jnp.asarray(_pad_to(pw.T, CPAD, CPAD)).astype(jnp.bfloat16),
            ))
        else:
            # No BN: SkeletonPool pre-composed into conv weight / bias / offset.
            packed_enc.append(dict(
                w=_pack_w([(pw @ W[:, :, k]).T for k in range(K)]),
                b=_pack_row(pw @ bvec),
                offw=_pack_mat((pw @ offW).T),
                offb=_pack_row(pw @ offb),
            ))

        topologies.append(new_edges)
        pooling_lists.append(pooling_list)
        edge_num.append(len(pooling_list))

    raw_dec, packed_dec = [], []
    for i in range(L):
        li = L - i - 1
        in_channels = channel_list[L - i]
        out_channels = in_channels // 2
        neighbor_list = find_neighbor(topologies[li], args.skeleton_dist)
        joint_num = edge_num[li]
        in_cpj = in_channels // joint_num
        out_cpj = out_channels // joint_num
        in_off = 3 * channel_base[li] // channel_base[0]

        mask = _conv_mask(neighbor_list, in_cpj, out_cpj, K)
        off_mask = _linear_mask(neighbor_list, in_off, out_cpj)
        W = rnd((out_channels, in_channels, K)) * mask
        bvec = rnd((out_channels,))
        offW = rnd((out_channels, in_off * joint_num)) * off_mask
        offb = rnd((out_channels,))

        up = unpool_weight(pooling_lists[li], in_channels // len(neighbor_list))
        raw_dec.append(dict(W=jnp.asarray(W), b=jnp.asarray(bvec),
                            offW=jnp.asarray(offW), offb=jnp.asarray(offb),
                            unpool=jnp.asarray(up)))
        # SkeletonUnpool is a time-independent channel mix -> fold into conv weight.
        packed_dec.append(dict(
            w=_pack_w([(W[:, :, k] @ up).T for k in range(K)]),
            b=_pack_row(bvec),
            offw=_pack_mat(offW.T),
            offb=_pack_row(offb),
        ))

    meta = dict(channel_base=channel_base, edge_num=edge_num,
                padding=(K - 1) // 2, c_in=channel_list[0],
                c_latent=edge_num[-1] * channel_base[-1])
    return dict(enc=raw_enc, dec=raw_dec), dict(enc=packed_enc, dec=packed_dec), meta


# --------------------------------------------------------------------------
# Pure-JAX (f32) reference forward, faithful to the torch layer sequence.
# --------------------------------------------------------------------------
def _ref_conv_reflect(h, W, b, stride, padding):
    B, T, _ = h.shape
    K = W.shape[2]
    hp = jnp.pad(h, ((0, 0), (padding, padding), (0, 0)), mode='reflect')
    T_out = (T + 2 * padding - K) // stride + 1
    y = jnp.zeros((B, T_out, W.shape[0]), jnp.float32)
    for k in range(K):
        xk = hp[:, k: k + stride * (T_out - 1) + 1: stride, :]
        y = y + jnp.einsum('btc,oc->bto', xk, W[:, :, k])
    return y + b[None, None, :]


def _ref_upsample2(h):
    B, T, C = h.shape
    i = np.arange(2 * T)
    src = np.maximum((i + 0.5) * 0.5 - 0.5, 0.0)
    i0 = np.floor(src).astype(np.int32)
    i1 = np.minimum(i0 + 1, T - 1)
    lam = jnp.asarray((src - i0).astype(np.float32))[None, :, None]
    return h[:, i0, :] * (1.0 - lam) + h[:, i1, :] * lam


def ref_forward(raw, x, offsets, *, num_layers, padding):
    B = x.shape[0]
    eps = 1e-5
    h = jnp.transpose(x, (0, 2, 1)).astype(jnp.float32)
    for i, lp in enumerate(raw['enc']):
        y = _ref_conv_reflect(h, lp['W'], lp['b'], stride=2, padding=padding)
        off = offsets[i].reshape(B, -1)
        y = y + ((off @ lp['offW'].T + lp['offb']) * 0.01)[:, None, :]
        if lp['bn']:
            mu = jnp.mean(y, axis=(0, 1), keepdims=True)
            var = jnp.mean((y - mu) ** 2, axis=(0, 1), keepdims=True)
            y = (y - mu) * lax.rsqrt(var + eps) * lp['gamma'][None, None, :] \
                + lp['beta'][None, None, :]
        y = jnp.einsum('btc,pc->btp', y, lp['pool'])
        h = jnp.where(y >= 0, y, 0.2 * y)
    latent = jnp.transpose(h, (0, 2, 1))
    for i, lp in enumerate(raw['dec']):
        h = _ref_upsample2(h)
        h = jnp.einsum('btc,oc->bto', h, lp['unpool'])
        y = _ref_conv_reflect(h, lp['W'], lp['b'], stride=1, padding=padding)
        off = offsets[num_layers - 1 - i].reshape(B, -1)
        y = y + ((off @ lp['offW'].T + lp['offb']) * 0.01)[:, None, :]
        if i != num_layers - 1:
            y = jnp.where(y >= 0, y, 0.2 * y)
        h = y
    result = jnp.transpose(h, (0, 2, 1))
    return latent, result


def _max_rel_err(a, b):
    return float(jnp.max(jnp.abs(a - b)) / (jnp.max(jnp.abs(b)) + 1e-6))


# --------------------------------------------------------------------------
if __name__ == "__main__":
    args = Args()
    # small skeleton: 7 joints, 6 edges (two chains of length 3 from the root)
    topology = [(0, 1), (1, 2), (2, 3), (0, 4), (4, 5), (5, 6)]
    typeofchannel = 3

    raw, packed, meta = make_ae_params(jax.random.PRNGKey(42), args, topology,
                                       typeofchannel)

    B, T = 2, 16
    C_in = meta['c_in']                               # 21
    key = jax.random.PRNGKey(0)
    kx, k0, k1 = jax.random.split(key, 3)
    x = jax.random.normal(kx, (B, C_in, T), dtype=jnp.float32)
    # offsets[i]: (B, edge_num[i], 3 * channel_base[i] / channel_base[0])
    offsets = tuple(
        jax.random.normal(k, (B, meta['edge_num'][i],
                              3 * meta['channel_base'][i] // meta['channel_base'][0]),
                          dtype=jnp.float32)
        for i, k in enumerate((k0, k1)))

    fwd = jax.jit(functools.partial(
        ae_forward, num_layers=args.num_layers, padding=meta['padding'],
        K=args.kernel_size, c_latent=meta['c_latent'], c_out=C_in))
    latent, result = fwd(packed, x, offsets)
    jax.block_until_ready(latent)
    jax.block_until_ready(result)

    assert latent.shape == (B, meta['c_latent'], T // (2 ** args.num_layers)), latent.shape
    assert result.shape == (B, C_in, T), result.shape
    assert bool(jnp.all(jnp.isfinite(latent))) and bool(jnp.all(jnp.isfinite(result)))

    # Pure-JAX f32 reference (training-mode BN); bf16 MXU operands in the kernel
    # give small drift, so use a generous (but bug-catching) tolerance.
    lat_ref, res_ref = ref_forward(raw, x, offsets, num_layers=args.num_layers,
                                   padding=meta['padding'])
    err_lat = _max_rel_err(latent, lat_ref)
    err_res = _max_rel_err(result, res_ref)
    assert err_lat < 0.08, f"latent mismatch: rel err {err_lat}"
    assert err_res < 0.08, f"result mismatch: rel err {err_res}"

    print("KERNEL_OK")
</pallas_src>

<mosaic_0001>
module attributes {stable_mosaic.version = 11 : i64} {
  func.func @kernel(%arg0: memref<32x128xf32, #tpu.memory_space<vmem>>, %arg1: memref<48x32xf32, #tpu.memory_space<vmem>>, %arg2: memref<384x128xbf16, #tpu.memory_space<vmem>>, %arg3: memref<1x128xf32, #tpu.memory_space<vmem>>, %arg4: memref<128x128xf32, #tpu.memory_space<vmem>>, %arg5: memref<1x128xf32, #tpu.memory_space<vmem>>, %arg6: memref<2x128xf32, #tpu.memory_space<vmem>>, %arg7: memref<1x128xf32, #tpu.memory_space<vmem>>, %arg8: memref<1x128xf32, #tpu.memory_space<vmem>>, %arg9: memref<128x128xbf16, #tpu.memory_space<vmem>>, %arg10: memref<24x16xf32, #tpu.memory_space<vmem>>, %arg11: memref<384x128xbf16, #tpu.memory_space<vmem>>, %arg12: memref<1x128xf32, #tpu.memory_space<vmem>>, %arg13: memref<128x128xf32, #tpu.memory_space<vmem>>, %arg14: memref<1x128xf32, #tpu.memory_space<vmem>>, %arg15: memref<2x128xf32, #tpu.memory_space<vmem>>, %arg16: memref<48x8xf32, #tpu.memory_space<vmem>>, %arg17: memref<384x128xbf16, #tpu.memory_space<vmem>>, %arg18: memref<1x128xf32, #tpu.memory_space<vmem>>, %arg19: memref<128x128xf32, #tpu.memory_space<vmem>>, %arg20: memref<1x128xf32, #tpu.memory_space<vmem>>, %arg21: memref<2x128xf32, #tpu.memory_space<vmem>>, %arg22: memref<96x16xf32, #tpu.memory_space<vmem>>, %arg23: memref<384x128xbf16, #tpu.memory_space<vmem>>, %arg24: memref<1x128xf32, #tpu.memory_space<vmem>>, %arg25: memref<128x128xf32, #tpu.memory_space<vmem>>, %arg26: memref<1x128xf32, #tpu.memory_space<vmem>>, %arg27: memref<2x128xf32, #tpu.memory_space<vmem>>, %arg28: memref<8x128xf32, #tpu.memory_space<vmem>>, %arg29: memref<32x128xf32, #tpu.memory_space<vmem>>) attributes {dimension_semantics = [], scalar_prefetch = 0 : i64, scratch_operands = 0 : i64, tpu.core_type = #tpu.core_type<tc>} {
    %c0 = arith.constant 0 : index
    %c0_0 = arith.constant 0 : index
    %0 = vector.load %arg0[%c0, %c0_0] : memref<32x128xf32, #tpu.memory_space<vmem>>, vector<32x128xf32>
    %c0_1 = arith.constant 0 : index
    %c0_2 = arith.constant 0 : index
    %1 = vector.load %arg1[%c0_1, %c0_2] : memref<48x32xf32, #tpu.memory_space<vmem>>, vector<16x32xf32>
    %cst = arith.constant dense<0.000000e+00> : vector<16x128xf32>
    %2 = tpu.matmul %1, %0, %cst {dimension_numbers = #tpu.dot_dimension_numbers<[1], [0], [0], [1], [0, 0, 1, 1], [], []>} : vector<16x32xf32>, vector<32x128xf32>, vector<16x128xf32> -> vector<16x128xf32>
    %c16 = arith.constant 16 : index
    %c0_3 = arith.constant 0 : index
    %3 = vector.load %arg1[%c16, %c0_3] : memref<48x32xf32, #tpu.memory_space<vmem>>, vector<16x32xf32>
    %cst_4 = arith.constant dense<0.000000e+00> : vector<16x128xf32>
    %4 = tpu.matmul %3, %0, %cst_4 {dimension_numbers = #tpu.dot_dimension_numbers<[1], [0], [0], [1], [0, 0, 1, 1], [], []>} : vector<16x32xf32>, vector<32x128xf32>, vector<16x128xf32> -> vector<16x128xf32>
    %c32 = arith.constant 32 : index
    %c0_5 = arith.constant 0 : index
    %5 = vector.load %arg1[%c32, %c0_5] : memref<48x32xf32, #tpu.memory_space<vmem>>, vector<16x32xf32>
    %cst_6 = arith.constant dense<0.000000e+00> : vector<16x128xf32>
    %6 = tpu.matmul %5, %0, %cst_6 {dimension_numbers = #tpu.dot_dimension_numbers<[1], [0], [0], [1], [0, 0, 1, 1], [], []>} : vector<16x32xf32>, vector<32x128xf32>, vector<16x128xf32> -> vector<16x128xf32>
    %7 = tpu.concatenate %2, %4, %6 in 1 : vector<16x128xf32>, vector<16x128xf32>, vector<16x128xf32> -> vector<16x384xf32>
    %8 = arith.truncf %7 : vector<16x384xf32> to vector<16x384xbf16>
    %c0_7 = arith.constant 0 : index
    %c0_8 = arith.constant 0 : index
    %9 = vector.load %arg2[%c0_7, %c0_8] : memref<384x128xbf16, #tpu.memory_space<vmem>>, vector<384x128xbf16>
    %cst_9 = arith.constant dense<0.000000e+00> : vector<16x128xf32>
    %10 = tpu.matmul %8, %9, %cst_9 {dimension_numbers = #tpu.dot_dimension_numbers<[1], [0], [0], [1], [0, 0, 1, 1], [], []>} : vector<16x384xbf16>, vector<384x128xbf16>, vector<16x128xf32> -> vector<16x128xf32>
    %c0_10 = arith.constant 0 : index
    %c0_11 = arith.constant 0 : index
    %11 = vector.load %arg6[%c0_10, %c0_11] : memref<2x128xf32, #tpu.memory_space<vmem>>, vector<2x128xf32>
    %c0_12 = arith.constant 0 : index
    %c0_13 = arith.constant 0 : index
    %12 = vector.load %arg4[%c0_12, %c0_13] : memref<128x128xf32, #tpu.memory_space<vmem>>, vector<128x128xf32>
    %cst_14 = arith.constant dense<0.000000e+00> : vector<2x128xf32>
    %13 = tpu.matmul %11, %12, %cst_14 {dimension_numbers = #tpu.dot_dimension_numbers<[1], [0], [0], [1], [0, 0, 1, 1], [], []>} : vector<2x128xf32>, vector<128x128xf32>, vector<2x128xf32> -> vector<2x128xf32>
    %c0_15 = arith.constant 0 : index
    %c0_16 = arith.constant 0 : index
    %14 = vector.load %arg5[%c0_15, %c0_16] : memref<1x128xf32, #tpu.memory_space<vmem>>, vector<1x128xf32>
    %15 = vector.broadcast %14 : vector<1x128xf32> to vector<2x128xf32>
    %16 = arith.addf %13, %15 : vector<2x128xf32>
    %cst_17 = arith.constant 0.00999999977 : f32
    %17 = vector.broadcast %cst_17 : f32 to vector<2x128xf32>
    %18 = arith.mulf %16, %17 : vector<2x128xf32>
    %19 = tpu.iota {dimensions = array<i32: 0>} : vector<16x128xi32>
    %cst_18 = arith.constant 0.000000e+00 : f32
    %20 = vector.broadcast %cst_18 : f32 to vector<16x128xf32>
    %c0_i32 = arith.constant 0 : i32
    %21 = vector.broadcast %c0_i32 : i32 to vector<16x128xi32>
    %22 = arith.cmpi sge, %19, %21 : vector<16x128xi32>
    %c8_i32 = arith.constant 8 : i32
    %23 = vector.broadcast %c8_i32 : i32 to vector<16x128xi32>
    %24 = arith.cmpi slt, %19, %23 : vector<16x128xi32>
    %25 = arith.andi %22, %24 : vector<16x128xi1>
    %26 = vector.extract_strided_slice %18 {offsets = [0, 0], sizes = [1, 128], strides = [1, 1]} : vector<2x128xf32> to vector<1x128xf32>
    %27 = vector.shape_cast %26 : vector<1x128xf32> to vector<1x128xf32>
    %28 = vector.broadcast %27 : vector<1x128xf32> to vector<16x128xf32>
    %29 = arith.select %25, %28, %20 : vector<16x128xi1>, vector<16x128xf32>
    %c8_i32_19 = arith.constant 8 : i32
    %30 = vector.broadcast %c8_i32_19 : i32 to vector<16x128xi32>
    %31 = arith.cmpi sge, %19, %30 : vector<16x128xi32>
    %c16_i32 = arith.constant 16 : i32
    %32 = vector.broadcast %c16_i32 : i32 to vector<16x128xi32>
    %33 = arith.cmpi slt, %19, %32 : vector<16x128xi32>
    %34 = arith.andi %31, %33 : vector<16x128xi1>
    %35 = vector.extract_strided_slice %18 {offsets = [1, 0], sizes = [1, 128], strides = [1, 1]} : vector<2x128xf32> to vector<1x128xf32>
    %36 = vector.shape_cast %35 : vector<1x128xf32> to vector<1x128xf32>
    %37 = vector.broadcast %36 : vector<1x128xf32> to vector<16x128xf32>
    %38 = arith.select %34, %37, %29 : vector<16x128xi1>, vector<16x128xf32>
    %c0_20 = arith.constant 0 : index
    %c0_21 = arith.constant 0 : index
    %39 = vector.load %arg3[%c0_20, %c0_21] : memref<1x128xf32, #tpu.memory_space<vmem>>, vector<1x128xf32>
    %40 = vector.broadcast %39 : vector<1x128xf32> to vector<16x128xf32>
    %41 = arith.addf %10, %40 : vector<16x128xf32>
    %42 = arith.addf %41, %38 : vector<16x128xf32>
    %cst_22 = arith.constant dense<0.000000e+00> : vector<128xf32>
    %43 = vector.multi_reduction <add>, %42, %cst_22 [0] : vector<16x128xf32> to vector<128xf32>
    %44 = vector.shape_cast %43 : vector<128xf32> to vector<1x128xf32>
    %cst_23 = arith.constant 6.250000e-02 : f32
    %45 = vector.broadcast %cst_23 : f32 to vector<1x128xf32>
    %46 = arith.mulf %44, %45 : vector<1x128xf32>
    %47 = arith.mulf %42, %42 : vector<16x128xf32>
    %cst_24 = arith.constant dense<0.000000e+00> : vector<128xf32>
    %48 = vector.multi_reduction <add>, %47, %cst_24 [0] : vector<16x128xf32> to vector<128xf32>
    %49 = vector.shape_cast %48 : vector<128xf32> to vector<1x128xf32>
    %cst_25 = arith.constant 6.250000e-02 : f32
    %50 = vector.broadcast %cst_25 : f32 to vector<1x128xf32>
    %51 = arith.mulf %49, %50 : vector<1x128xf32>
    %52 = arith.mulf %46, %46 : vector<1x128xf32>
    %53 = arith.subf %51, %52 : vector<1x128xf32>
    %54 = vector.broadcast %46 : vector<1x128xf32> to vector<16x128xf32>
    %55 = arith.subf %42, %54 : vector<16x128xf32>
    %cst_26 = arith.constant 9.99999974E-6 : f32
    %56 = vector.broadcast %cst_26 : f32 to vector<1x128xf32>
    %57 = arith.addf %53, %56 : vector<1x128xf32>
    %58 = math.rsqrt %57 : vector<1x128xf32>
    %59 = vector.broadcast %58 : vector<1x128xf32> to vector<16x128xf32>
    %60 = arith.mulf %55, %59 : vector<16x128xf32>
    %c0_27 = arith.constant 0 : index
    %c0_28 = arith.constant 0 : index
    %61 = vector.load %arg7[%c0_27, %c0_28] : memref<1x128xf32, #tpu.memory_space<vmem>>, vector<1x128xf32>
    %62 = vector.broadcast %61 : vector<1x128xf32> to vector<16x128xf32>
    %63 = arith.mulf %60, %62 : vector<16x128xf32>
    %c0_29 = arith.constant 0 : index
    %c0_30 = arith.constant 0 : index
    %64 = vector.load %arg8[%c0_29, %c0_30] : memref<1x128xf32, #tpu.memory_space<vmem>>, vector<1x128xf32>
    %65 = vector.broadcast %64 : vector<1x128xf32> to vector<16x128xf32>
    %66 = arith.addf %63, %65 : vector<16x128xf32>
    %67 = arith.truncf %66 : vector<16x128xf32> to vector<16x128xbf16>
    %c0_31 = arith.constant 0 : index
    %c0_32 = arith.constant 0 : index
    %68 = vector.load %arg9[%c0_31, %c0_32] : memref<128x128xbf16, #tpu.memory_space<vmem>>, vector<128x128xbf16>
    %cst_33 = arith.constant dense<0.000000e+00> : vector<16x128xf32>
    %69 = tpu.matmul %67, %68, %cst_33 {dimension_numbers = #tpu.dot_dimension_numbers<[1], [0], [0], [1], [0, 0, 1, 1], [], []>} : vector<16x128xbf16>, vector<128x128xbf16>, vector<16x128xf32> -> vector<16x128xf32>
    %cst_34 = arith.constant 0.000000e+00 : f32
    %70 = vector.broadcast %cst_34 : f32 to vector<16x128xf32>
    %71 = arith.cmpf oge, %69, %70 : vector<16x128xf32>
    %cst_35 = arith.constant 2.000000e-01 : f32
    %72 = vector.broadcast %cst_35 : f32 to vector<16x128xf32>
    %73 = arith.mulf %72, %69 : vector<16x128xf32>
    %74 = arith.select %71, %69, %73 : vector<16x128xi1>, vector<16x128xf32>
    %c0_36 = arith.constant 0 : index
    %c0_37 = arith.constant 0 : index
    %75 = vector.load %arg10[%c0_36, %c0_37] : memref<24x16xf32, #tpu.memory_space<vmem>>, vector<8x16xf32>
    %cst_38 = arith.constant dense<0.000000e+00> : vector<8x128xf32>
    %76 = tpu.matmul %75, %74, %cst_38 {dimension_numbers = #tpu.dot_dimension_numbers<[1], [0], [0], [1], [0, 0, 1, 1], [], []>} : vector<8x16xf32>, vector<16x128xf32>, vector<8x128xf32> -> vector<8x128xf32>
    %c8 = arith.constant 8 : index
    %c0_39 = arith.constant 0 : index
    %77 = vector.load %arg10[%c8, %c0_39] : memref<24x16xf32, #tpu.memory_space<vmem>>, vector<8x16xf32>
    %cst_40 = arith.constant dense<0.000000e+00> : vector<8x128xf32>
    %78 = tpu.matmul %77, %74, %cst_40 {dimension_numbers = #tpu.dot_dimension_numbers<[1], [0], [0], [1], [0, 0, 1, 1], [], []>} : vector<8x16xf32>, vector<16x128xf32>, vector<8x128xf32> -> vector<8x128xf32>
    %c16_41 = arith.constant 16 : index
    %c0_42 = arith.constant 0 : index
    %79 = vector.load %arg10[%c16_41, %c0_42] : memref<24x16xf32, #tpu.memory_space<vmem>>, vector<8x16xf32>
    %cst_43 = arith.constant dense<0.000000e+00> : vector<8x128xf32>
    %80 = tpu.matmul %79, %74, %cst_43 {dimension_numbers = #tpu.dot_dimension_numbers<[1], [0], [0], [1], [0, 0, 1, 1], [], []>} : vector<8x16xf32>, vector<16x128xf32>, vector<8x128xf32> -> vector<8x128xf32>
    %81 = tpu.concatenate %76, %78, %80 in 1 : vector<8x128xf32>, vector<8x128xf32>, vector<8x128xf32> -> vector<8x384xf32>
    %82 = arith.truncf %81 : vector<8x384xf32> to vector<8x384xbf16>
    %c0_44 = arith.constant 0 : index
    %c0_45 = arith.constant 0 : index
    %83 = vector.load %arg11[%c0_44, %c0_45] : memref<384x128xbf16, #tpu.memory_space<vmem>>, vector<384x128xbf16>
    %cst_46 = arith.constant dense<0.000000e+00> : vector<8x128xf32>
    %84 = tpu.matmul %82, %83, %cst_46 {dimension_numbers = #tpu.dot_dimension_numbers<[1], [0], [0], [1], [0, 0, 1, 1], [], []>} : vector<8x384xbf16>, vector<384x128xbf16>, vector<8x128xf32> -> vector<8x128xf32>
    %c0_47 = arith.constant 0 : index
    %c0_48 = arith.constant 0 : index
    %85 = vector.load %arg15[%c0_47, %c0_48] : memref<2x128xf32, #tpu.memory_space<vmem>>, vector<2x128xf32>
    %c0_49 = arith.constant 0 : index
    %c0_50 = arith.constant 0 : index
    %86 = vector.load %arg13[%c0_49, %c0_50] : memref<128x128xf32, #tpu.memory_space<vmem>>, vector<128x128xf32>
    %cst_51 = arith.constant dense<0.000000e+00> : vector<2x128xf32>
    %87 = tpu.matmul %85, %86, %cst_51 {dimension_numbers = #tpu.dot_dimension_numbers<[1], [0], [0], [1], [0, 0, 1, 1], [], []>} : vector<2x128xf32>, vector<128x128xf32>, vector<2x128xf32> -> vector<2x128xf32>
    %c0_52 = arith.constant 0 : index
    %c0_53 = arith.constant 0 : index
    %88 = vector.load %arg14[%c0_52, %c0_53] : memref<1x128xf32, #tpu.memory_space<vmem>>, vector<1x128xf32>
    %89 = vector.broadcast %88 : vector<1x128xf32> to vector<2x128xf32>
    %90 = arith.addf %87, %89 : vector<2x128xf32>
    %cst_54 = arith.constant 0.00999999977 : f32
    %91 = vector.broadcast %cst_54 : f32 to vector<2x128xf32>
    %92 = arith.mulf %90, %91 : vector<2x128xf32>
    %93 = tpu.iota {dimensions = array<i32: 0>} : vector<8x128xi32>
    %cst_55 = arith.constant 0.000000e+00 : f32
    %94 = vector.broadcast %cst_55 : f32 to vector<8x128xf32>
    %c0_i32_56 = arith.constant 0 : i32
    %95 = vector.broadcast %c0_i32_56 : i32 to vector<8x128xi32>
    %96 = arith.cmpi sge, %93, %95 : vector<8x128xi32>
    %c4_i32 = arith.constant 4 : i32
    %97 = vector.broadcast %c4_i32 : i32 to vector<8x128xi32>
    %98 = arith.cmpi slt, %93, %97 : vector<8x128xi32>
    %99 = arith.andi %96, %98 : vector<8x128xi1>
    %100 = vector.extract_strided_slice %92 {offsets = [0, 0], sizes = [1, 128], strides = [1, 1]} : vector<2x128xf32> to vector<1x128xf32>
    %101 = vector.shape_cast %100 : vector<1x128xf32> to vector<1x128xf32>
    %102 = vector.broadcast %101 : vector<1x128xf32> to vector<8x128xf32>
    %103 = arith.select %99, %102, %94 : vector<8x128xi1>, vector<8x128xf32>
    %c4_i32_57 = arith.constant 4 : i32
    %104 = vector.broadcast %c4_i32_57 : i32 to vector<8x128xi32>
    %105 = arith.cmpi sge, %93, %104 : vector<8x128xi32>
    %c8_i32_58 = arith.constant 8 : i32
    %106 = vector.broadcast %c8_i32_58 : i32 to vector<8x128xi32>
    %107 = arith.cmpi slt, %93, %106 : vector<8x128xi32>
    %108 = arith.andi %105, %107 : vector<8x128xi1>
    %109 = vector.extract_strided_slice %92 {offsets = [1, 0], sizes = [1, 128], strides = [1, 1]} : vector<2x128xf32> to vector<1x128xf32>
    %110 = vector.shape_cast %109 : vector<1x128xf32> to vector<1x128xf32>
    %111 = vector.broadcast %110 : vector<1x128xf32> to vector<8x128xf32>
    %112 = arith.select %108, %111, %103 : vector<8x128xi1>, vector<8x128xf32>
    %c0_59 = arith.constant 0 : index
    %c0_60 = arith.constant 0 : index
    %113 = vector.load %arg12[%c0_59, %c0_60] : memref<1x128xf32, #tpu.memory_space<vmem>>, vector<1x128xf32>
    %114 = vector.broadcast %113 : vector<1x128xf32> to vector<8x128xf32>
    %115 = arith.addf %84, %114 : vector<8x128xf32>
    %116 = arith.addf %115, %112 : vector<8x128xf32>
    %cst_61 = arith.constant 0.000000e+00 : f32
    %117 = vector.broadcast %cst_61 : f32 to vector<8x128xf32>
    %118 = arith.cmpf oge, %116, %117 : vector<8x128xf32>
    %cst_62 = arith.constant 2.000000e-01 : f32
    %119 = vector.broadcast %cst_62 : f32 to vector<8x128xf32>
    %120 = arith.mulf %119, %116 : vector<8x128xf32>
    %121 = arith.select %118, %116, %120 : vector<8x128xi1>, vector<8x128xf32>
    %c0_63 = arith.constant 0 : index
    %c0_64 = arith.constant 0 : index
    %122 = vector.load %arg28[%c0_63, %c0_64] : memref<8x128xf32, #tpu.memory_space<vmem>>, vector<8x128xf32>
    tpu.vector_store %arg28[%c0_63, %c0_64], %121 {strides = array<i32>} : memref<8x128xf32, #tpu.memory_space<vmem>>, vector<8x128xf32>,
    %c0_65 = arith.constant 0 : index
    %c0_66 = arith.constant 0 : index
    %123 = vector.load %arg16[%c0_65, %c0_66] : memref<48x8xf32, #tpu.memory_space<vmem>>, vector<16x8xf32>
    %cst_67 = arith.constant dense<0.000000e+00> : vector<16x128xf32>
    %124 = tpu.matmul %123, %121, %cst_67 {dimension_numbers = #tpu.dot_dimension_numbers<[1], [0], [0], [1], [0, 0, 1, 1], [], []>} : vector<16x8xf32>, vector<8x128xf32>, vector<16x128xf32> -> vector<16x128xf32>
    %c16_68 = arith.constant 16 : index
    %c0_69 = arith.constant 0 : index
    %125 = vector.load %arg16[%c16_68, %c0_69] : memref<48x8xf32, #tpu.memory_space<vmem>>, vector<16x8xf32>
    %cst_70 = arith.constant dense<0.000000e+00> : vector<16x128xf32>
    %126 = tpu.matmul %125, %121, %cst_70 {dimension_numbers = #tpu.dot_dimension_numbers<[1], [0], [0], [1], [0, 0, 1, 1], [], []>} : vector<16x8xf32>, vector<8x128xf32>, vector<16x128xf32> -> vector<16x128xf32>
    %c32_71 = arith.constant 32 : index
    %c0_72 = arith.constant 0 : index
    %127 = vector.load %arg16[%c32_71, %c0_72] : memref<48x8xf32, #tpu.memory_space<vmem>>, vector<16x8xf32>
    %cst_73 = arith.constant dense<0.000000e+00> : vector<16x128xf32>
    %128 = tpu.matmul %127, %121, %cst_73 {dimension_numbers = #tpu.dot_dimension_numbers<[1], [0], [0], [1], [0, 0, 1, 1], [], []>} : vector<16x8xf32>, vector<8x128xf32>, vector<16x128xf32> -> vector<16x128xf32>
    %129 = tpu.concatenate %124, %126, %128 in 1 : vector<16x128xf32>, vector<16x128xf32>, vector<16x128xf32> -> vector<16x384xf32>
    %130 = arith.truncf %129 : vector<16x384xf32> to vector<16x384xbf16>
    %c0_74 = arith.constant 0 : index
    %c0_75 = arith.constant 0 : index
    %131 = vector.load %arg17[%c0_74, %c0_75] : memref<384x128xbf16, #tpu.memory_space<vmem>>, vector<384x128xbf16>
    %cst_76 = arith.constant dense<0.000000e+00> : vector<16x128xf32>
    %132 = tpu.matmul %130, %131, %cst_76 {dimension_numbers = #tpu.dot_dimension_numbers<[1], [0], [0], [1], [0, 0, 1, 1], [], []>} : vector<16x384xbf16>, vector<384x128xbf16>, vector<16x128xf32> -> vector<16x128xf32>
    %c0_77 = arith.constant 0 : index
    %c0_78 = arith.constant 0 : index
    %133 = vector.load %arg21[%c0_77, %c0_78] : memref<2x128xf32, #tpu.memory_space<vmem>>, vector<2x128xf32>
    %c0_79 = arith.constant 0 : index
    %c0_80 = arith.constant 0 : index
    %134 = vector.load %arg19[%c0_79, %c0_80] : memref<128x128xf32, #tpu.memory_space<vmem>>, vector<128x128xf32>
    %cst_81 = arith.constant dense<0.000000e+00> : vector<2x128xf32>
    %135 = tpu.matmul %133, %134, %cst_81 {dimension_numbers = #tpu.dot_dimension_numbers<[1], [0], [0], [1], [0, 0, 1, 1], [], []>} : vector<2x128xf32>, vector<128x128xf32>, vector<2x128xf32> -> vector<2x128xf32>
    %c0_82 = arith.constant 0 : index
    %c0_83 = arith.constant 0 : index
    %136 = vector.load %arg20[%c0_82, %c0_83] : memref<1x128xf32, #tpu.memory_space<vmem>>, vector<1x128xf32>
    %137 = vector.broadcast %136 : vector<1x128xf32> to vector<2x128xf32>
    %138 = arith.addf %135, %137 : vector<2x128xf32>
    %cst_84 = arith.constant 0.00999999977 : f32
    %139 = vector.broadcast %cst_84 : f32 to vector<2x128xf32>
    %140 = arith.mulf %138, %139 : vector<2x128xf32>
    %141 = tpu.iota {dimensions = array<i32: 0>} : vector<16x128xi32>
    %cst_85 = arith.constant 0.000000e+00 : f32
    %142 = vector.broadcast %cst_85 : f32 to vector<16x128xf32>
    %c0_i32_86 = arith.constant 0 : i32
    %143 = vector.broadcast %c0_i32_86 : i32 to vector<16x128xi32>
    %144 = arith.cmpi sge, %141, %143 : vector<16x128xi32>
    %c8_i32_87 = arith.constant 8 : i32
    %145 = vector.broadcast %c8_i32_87 : i32 to vector<16x128xi32>
    %146 = arith.cmpi slt, %141, %145 : vector<16x128xi32>
    %147 = arith.andi %144, %146 : vector<16x128xi1>
    %148 = vector.extract_strided_slice %140 {offsets = [0, 0], sizes = [1, 128], strides = [1, 1]} : vector<2x128xf32> to vector<1x128xf32>
    %149 = vector.shape_cast %148 : vector<1x128xf32> to vector<1x128xf32>
    %150 = vector.broadcast %149 : vector<1x128xf32> to vector<16x128xf32>
    %151 = arith.select %147, %150, %142 : vector<16x128xi1>, vector<16x128xf32>
    %c8_i32_88 = arith.constant 8 : i32
    %152 = vector.broadcast %c8_i32_88 : i32 to vector<16x128xi32>
    %153 = arith.cmpi sge, %141, %152 : vector<16x128xi32>
    %c16_i32_89 = arith.constant 16 : i32
    %154 = vector.broadcast %c16_i32_89 : i32 to vector<16x128xi32>
    %155 = arith.cmpi slt, %141, %154 : vector<16x128xi32>
    %156 = arith.andi %153, %155 : vector<16x128xi1>
    %157 = vector.extract_strided_slice %140 {offsets = [1, 0], sizes = [1, 128], strides = [1, 1]} : vector<2x128xf32> to vector<1x128xf32>
    %158 = vector.shape_cast %157 : vector<1x128xf32> to vector<1x128xf32>
    %159 = vector.broadcast %158 : vector<1x128xf32> to vector<16x128xf32>
    %160 = arith.select %156, %159, %151 : vector<16x128xi1>, vector<16x128xf32>
    %c0_90 = arith.constant 0 : index
    %c0_91 = arith.constant 0 : index
    %161 = vector.load %arg18[%c0_90, %c0_91] : memref<1x128xf32, #tpu.memory_space<vmem>>, vector<1x128xf32>
    %162 = vector.broadcast %161 : vector<1x128xf32> to vector<16x128xf32>
    %163 = arith.addf %132, %162 : vector<16x128xf32>
    %164 = arith.addf %163, %160 : vector<16x128xf32>
    %cst_92 = arith.constant 0.000000e+00 : f32
    %165 = vector.broadcast %cst_92 : f32 to vector<16x128xf32>
    %166 = arith.cmpf oge, %164, %165 : vector<16x128xf32>
    %cst_93 = arith.constant 2.000000e-01 : f32
    %167 = vector.broadcast %cst_93 : f32 to vector<16x128xf32>
    %168 = arith.mulf %167, %164 : vector<16x128xf32>
    %169 = arith.select %166, %164, %168 : vector<16x128xi1>, vector<16x128xf32>
    %c0_94 = arith.constant 0 : index
    %c0_95 = arith.constant 0 : index
    %170 = vector.load %arg22[%c0_94, %c0_95] : memref<96x16xf32, #tpu.memory_space<vmem>>, vector<32x16xf32>
    %cst_96 = arith.constant dense<0.000000e+00> : vector<32x128xf32>
    %171 = tpu.matmul %170, %169, %cst_96 {dimension_numbers = #tpu.dot_dimension_numbers<[1], [0], [0], [1], [0, 0, 1, 1], [], []>} : vector<32x16xf32>, vector<16x128xf32>, vector<32x128xf32> -> vector<32x128xf32>
    %c32_97 = arith.constant 32 : index
    %c0_98 = arith.constant 0 : index
    %172 = vector.load %arg22[%c32_97, %c0_98] : memref<96x16xf32, #tpu.memory_space<vmem>>, vector<32x16xf32>
    %cst_99 = arith.constant dense<0.000000e+00> : vector<32x128xf32>
    %173 = tpu.matmul %172, %169, %cst_99 {dimension_numbers = #tpu.dot_dimension_numbers<[1], [0], [0], [1], [0, 0, 1, 1], [], []>} : vector<32x16xf32>, vector<16x128xf32>, vector<32x128xf32> -> vector<32x128xf32>
    %c64 = arith.constant 64 : index
    %c0_100 = arith.constant 0 : index
    %174 = vector.load %arg22[%c64, %c0_100] : memref<96x16xf32, #tpu.memory_space<vmem>>, vector<32x16xf32>
    %cst_101 = arith.constant dense<0.000000e+00> : vector<32x128xf32>
    %175 = tpu.matmul %174, %169, %cst_101 {dimension_numbers = #tpu.dot_dimension_numbers<[1], [0], [0], [1], [0, 0, 1, 1], [], []>} : vector<32x16xf32>, vector<16x128xf32>, vector<32x128xf32> -> vector<32x128xf32>
    %176 = tpu.concatenate %171, %173, %175 in 1 : vector<32x128xf32>, vector<32x128xf32>, vector<32x128xf32> -> vector<32x384xf32>
    %177 = arith.truncf %176 : vector<32x384xf32> to vector<32x384xbf16>
    %c0_102 = arith.constant 0 : index
    %c0_103 = arith.constant 0 : index
    %178 = vector.load %arg23[%c0_102, %c0_103] : memref<384x128xbf16, #tpu.memory_space<vmem>>, vector<384x128xbf16>
    %cst_104 = arith.constant dense<0.000000e+00> : vector<32x128xf32>
    %179 = tpu.matmul %177, %178, %cst_104 {dimension_numbers = #tpu.dot_dimension_numbers<[1], [0], [0], [1], [0, 0, 1, 1], [], []>} : vector<32x384xbf16>, vector<384x128xbf16>, vector<32x128xf32> -> vector<32x128xf32>
    %c0_105 = arith.constant 0 : index
    %c0_106 = arith.constant 0 : index
    %180 = vector.load %arg27[%c0_105, %c0_106] : memref<2x128xf32, #tpu.memory_space<vmem>>, vector<2x128xf32>
    %c0_107 = arith.constant 0 : index
    %c0_108 = arith.constant 0 : index
    %181 = vector.load %arg25[%c0_107, %c0_108] : memref<128x128xf32, #tpu.memory_space<vmem>>, vector<128x128xf32>
    %cst_109 = arith.constant dense<0.000000e+00> : vector<2x128xf32>
    %182 = tpu.matmul %180, %181, %cst_109 {dimension_numbers = #tpu.dot_dimension_numbers<[1], [0], [0], [1], [0, 0, 1, 1], [], []>} : vector<2x128xf32>, vector<128x128xf32>, vector<2x128xf32> -> vector<2x128xf32>
    %c0_110 = arith.constant 0 : index
    %c0_111 = arith.constant 0 : index
    %183 = vector.load %arg26[%c0_110, %c0_111] : memref<1x128xf32, #tpu.memory_space<vmem>>, vector<1x128xf32>
    %184 = vector.broadcast %183 : vector<1x128xf32> to vector<2x128xf32>
    %185 = arith.addf %182, %184 : vector<2x128xf32>
    %cst_112 = arith.constant 0.00999999977 : f32
    %186 = vector.broadcast %cst_112 : f32 to vector<2x128xf32>
    %187 = arith.mulf %185, %186 : vector<2x128xf32>
    %188 = tpu.iota {dimensions = array<i32: 0>} : vector<32x128xi32>
    %cst_113 = arith.constant 0.000000e+00 : f32
    %189 = vector.broadcast %cst_113 : f32 to vector<32x128xf32>
    %c0_i32_114 = arith.constant 0 : i32
    %190 = vector.broadcast %c0_i32_114 : i32 to vector<32x128xi32>
    %191 = arith.cmpi sge, %188, %190 : vector<32x128xi32>
    %c16_i32_115 = arith.constant 16 : i32
    %192 = vector.broadcast %c16_i32_115 : i32 to vector<32x128xi32>
    %193 = arith.cmpi slt, %188, %192 : vector<32x128xi32>
    %194 = arith.andi %191, %193 : vector<32x128xi1>
    %195 = vector.extract_strided_slice %187 {offsets = [0, 0], sizes = [1, 128], strides = [1, 1]} : vector<2x128xf32> to vector<1x128xf32>
    %196 = vector.shape_cast %195 : vector<1x128xf32> to vector<1x128xf32>
    %197 = vector.broadcast %196 : vector<1x128xf32> to vector<32x128xf32>
    %198 = arith.select %194, %197, %189 : vector<32x128xi1>, vector<32x128xf32>
    %c16_i32_116 = arith.constant 16 : i32
    %199 = vector.broadcast %c16_i32_116 : i32 to vector<32x128xi32>
    %200 = arith.cmpi sge, %188, %199 : vector<32x128xi32>
    %c32_i32 = arith.constant 32 : i32
    %201 = vector.broadcast %c32_i32 : i32 to vector<32x128xi32>
    %202 = arith.cmpi slt, %188, %201 : vector<32x128xi32>
    %203 = arith.andi %200, %202 : vector<32x128xi1>
    %204 = vector.extract_strided_slice %187 {offsets = [1, 0], sizes = [1, 128], strides = [1, 1]} : vector<2x128xf32> to vector<1x128xf32>
    %205 = vector.shape_cast %204 : vector<1x128xf32> to vector<1x128xf32>
    %206 = vector.broadcast %205 : vector<1x128xf32> to vector<32x128xf32>
    %207 = arith.select %203, %206, %198 : vector<32x128xi1>, vector<32x128xf32>
    %c0_117 = arith.constant 0 : index
    %c0_118 = arith.constant 0 : index
    %208 = vector.load %arg24[%c0_117, %c0_118] : memref<1x128xf32, #tpu.memory_space<vmem>>, vector<1x128xf32>
    %209 = vector.broadcast %208 : vector<1x128xf32> to vector<32x128xf32>
    %210 = arith.addf %179, %209 : vector<32x128xf32>
    %211 = arith.addf %210, %207 : vector<32x128xf32>
    %c0_119 = arith.constant 0 : index
    %c0_120 = arith.constant 0 : index
    %212 = vector.load %arg29[%c0_119, %c0_120] : memref<32x128xf32, #tpu.memory_space<vmem>>, vector<32x128xf32>
    tpu.vector_store %arg29[%c0_119, %c0_120], %211 {strides = array<i32>} : memref<32x128xf32, #tpu.memory_space<vmem>>, vector<32x128xf32>,
    return
  }
}

</mosaic_0001>

<bundles_post_ra>
// kernel: ae_forward.1
= control target key start
LH: loop header
LB: loop body
LE: loop exit
PB: predicated region body
PF: predicated region fallthrough
CT: control target
= control target key end

     0   :  { %s4615_s6 = smov 1   ;;  %s4616_s10 = smov 2   ;;  %s5090_s0 = inlined_call_operand.smem [shape: u32[30], index: -1, kind: input, shape index: {}] }
   0x1   :  { %s4679_s5 = sld [smem:[%s5090_s0]]   ;;  %s4617_s14 = smov 3  }
   0x2   :  { %s4684_s9 = sld [smem:[%s5090_s0 + %s4615_s6]]   ;;  %s4618_s18 = smov 4  }
   0x3   :  { %s4689_s13 = sld [smem:[%s5090_s0 + %s4616_s10]]   ;;  %s4619_s22 = smov 5  }
   0x4   :  { %s4694_s17 = sld [smem:[%s5090_s0 + %s4617_s14]]   ;;  %s4620_s26 = smov 6  }
   0x5   :  { %s4699_s21 = sld [smem:[%s5090_s0 + %s4618_s18]]   ;;  %s4621_s30 = smov 7  }
   0x6   :  { %s4704_s25 = sld [smem:[%s5090_s0 + %s4619_s22]]   ;;  %s4622_s4 = smov 8  }
   0x7   :  { %5093 = sst [smem:[#allocation45_spill]] %s4679_s5  ;;  %s4623_s10 = smov 9  }
   0x8   :  { %s4709_s29 = sld [smem:[%s5090_s0 + %s4620_s26]]   ;;  %s4624_s15 = smov 10  }
   0x9   :  { %s4714_s3 = sld [smem:[%s5090_s0 + %s4621_s30]]   ;;  %s4625_s20 = smov 11  }
   0xa   :  { %5094 = sst [smem:[#allocation46_spill]] %s4694_s17  ;;  %s4626_s26 = smov 12  }
   0xb   :  { %s4719_s8 = sld [smem:[%s5090_s0 + %s4622_s4]]   ;;  %s4627_s1 = smov 13  }
   0xc   :  { %s4724_s14 = sld [smem:[%s5090_s0 + %s4623_s10]]   ;;  %s4628_s7 = smov 14  }
   0xd   :  { %s4729_s19 = sld [smem:[%s5090_s0 + %s4624_s15]]   ;;  %s4629_s15 = smov 15  }
   0xe   :  { %5095 = sst [smem:[#allocation47_spill]] %s4709_s29  ;;  %s4630_s22 = smov 16  }
   0xf   :  { %s4734_s24 = sld [smem:[%s5090_s0 + %s4625_s20]]   ;;  %s4631_s28 = smov 17  }
  0x10   :  { %s4739_s30 = sld [smem:[%s5090_s0 + %s4626_s26]]  }
  0x11   :  { %s4744_s6 = sld [smem:[%s5090_s0 + %s4627_s1]]  }
  0x12   :  { %s4749_s12 = sld [smem:[%s5090_s0 + %s4628_s7]]   ;;  %s4632_s7 = smov 18  }
  0x13   :  { %s4754_s20 = sld [smem:[%s5090_s0 + %s4629_s15]]   ;;  %s4633_s15 = smov 19  }
  0x14   :  { %s4759_s27 = sld [smem:[%s5090_s0 + %s4630_s22]]   ;;  %s4634_s22 = smov 20  }
  0x15   :  { %5096 = sst [smem:[#allocation48_spill]] %s4734_s24 }
  0x16   :  { %5097 = sst [smem:[#allocation49_spill]] %s4739_s30 }
  0x17   :  { %s4764_s4 = sld [smem:[%s5090_s0 + %s4631_s28]]   ;;  %s4635_s28 = smov 21  }
  0x18   :  { %5098 = sst [smem:[#allocation50_spill]] %s4749_s12 }
  0x19   :  { %5099 = sst [smem:[#allocation51_spill]] %s4754_s20 }
  0x1a   :  { %s4769_s24 = sld [smem:[%s5090_s0 + %s4632_s7]]   ;;  %s4636_s7 = smov 22  }
  0x1b   :  { %s4774_s20 = sld [smem:[%s5090_s0 + %s4633_s15]]   ;;  %s4637_s15 = smov 23  }
  0x1c   :  { %s4779_s17 = sld [smem:[%s5090_s0 + %s4634_s22]]   ;;  %s4638_s22 = smov 24  }
  0x1d   :  { %5100 = sst [smem:[#allocation52_spill]] %s4764_s4 }
  0x1e   :  { %s4784_s29 = sld [smem:[%s5090_s0 + %s4635_s28]]   ;;  %s4639_s28 = smov 25  }
  0x1f   :  { %s4789_s5 = sld [smem:[%s5090_s0 + %s4636_s7]]   ;;  %s4640_s7 = smov 26  }
  0x20   :  { %s4799_s4 = sld [smem:[%s5090_s0 + %s4638_s22]]   ;;  %s4642_s22 = smov 28  }
  0x21   :  { %5101 = sst [smem:[#allocation53_spill]] %s4774_s20 }
  0x22   :  { %s4794_s20 = sld [smem:[%s5090_s0 + %s4637_s15]]   ;;  %s4641_s15 = smov 27  }
  0x23   :  { %s4814_s12 = sld [smem:[%s5090_s0 + %s4641_s15]]  }
  0x24   :  { %5102 = sst [smem:[#allocation54_spill]] %s4784_s29 }
  0x25   :  { %5103 = sst [smem:[#allocation55_spill]] %s4789_s5 }
  0x26   :  { %5104 = sst [smem:[#allocation56_spill]] %s4799_s4 }
  0x27   :  { %s4804_s29 = sld [smem:[%s5090_s0 + %s4639_s28]]   ;;  %s4643_s28 = smov 29  }
  0x28   :  { %s4809_s5 = sld [smem:[%s5090_s0 + %s4640_s7]]  }
  0x29   :  { %s4819_s4 = sld [smem:[%s5090_s0 + %s4642_s22]]  }
  0x2a   :  { %s4824_s30 = sld [smem:[%s5090_s0 + %s4643_s28]]  }
  0x2b   :  { %65 = vsyncpa [#allocation3], 0 }
  0x2c   :  { %66 = vsyncpa [#allocation5], 0 }
  0x2d   :  { %67 = vsyncpa [#allocation8], 0 }
  0x2e   :  { %68 = vsyncpa [#allocation11], 0 }
  0x2f   :  { %69 = vsyncpa [#allocation14], 0 }
  0x30   :  { %70 = vsyncpa [#allocation17], 0 }
  0x31   :  { %71 = vsyncpa [#allocation20], 0 }
  0x32   :  { %72 = vsyncpa [#allocation23], 0 }
  0x33   :  { %73 = vsyncpa [#allocation26], 0 }
  0x34   :  { %74 = vsyncpa [#allocation29], 0 }
  0x35   :  { %75 = vsyncpa [#allocation32], 0  ;;  %s4644_s7 = smov [#allocation4]  }
  0x36   :  { %s95_s10 = sshll.u32 %s4644_s7, 4  ;;  %s96_s10 = int_to_ptr.vmem [resolvable:$true] %s95_s10 }
  0x37   :  { %s4181_s11 = scalar_lea.vmem %s96_s10, 3072  ;;  %p4186_p1 = scmp.lt.s32.totalorder %s96_s10, %s96_s10 }
  0x38   :  { %p4182_p0 = scmp.ne.s32.totalorder %s96_s10, %s4181_s11  ;;  %p4187_p2 = scmp.lt.s32.totalorder %s4181_s11, %s4181_s11 }
  0x3a   :  { %p4188_p3 = por %p4187_p2, %p4186_p1 }
  0x3c   :  { %p4189_p4 = pnand %p4188_p3, %p4182_p0 }
  0x3e   :  { %4192 = shalt.err (!%p4189_p4)
}
  0x3f   :  { %s4645_s0 = smov 64   ;;  %s4646_s15 = smov 4  }
  0x40   :  { %101 = dma.hbm_to_vmem [thread:$0]  %s4689_s13, 3072, %s96_s10, [#allocation5], %s4645_s0, %s4645_s0, %s4646_s15  }
  0x41   :  { %s4647_s16 = smov [#allocation7]   ;;  %s4648_s22 = smov [#allocation10]  }
  0x42   :  { %s122_s18 = sshll.u32 %s4647_s16, 4  ;;  %s144_s23 = sshll.u32 %s4648_s22, 4  ;;  %s123_s18 = int_to_ptr.vmem [resolvable:$true] %s122_s18  ;;  %s145_s23 = int_to_ptr.vmem [resolvable:$true] %s144_s23 }
  0x43   :  { %s4201_s26 = scalar_lea.vmem %s123_s18, 16  ;;  %s4205_s28 = scalar_lea.vmem %s123_s18, 32 }
  0x44   :  { %p4202_p5 = scmp.ne.s32.totalorder %s123_s18, %s4201_s26  ;;  %p4206_p6 = scmp.lt.s32.totalorder %s123_s18, %s123_s18 }
  0x45   :  { %p4207_p7 = scmp.lt.s32.totalorder %s4205_s28, %s4201_s26 }
  0x47   :  { %p4208_p8 = por %p4207_p7, %p4206_p6 }
  0x49   :  { %p4209_p9 = pnand %p4208_p8, %p4202_p5 }
  0x4b   :  { %4212 = shalt.err (!%p4209_p9)
}
  0x4c   :  { %125 = dma.hbm_to_vmem [thread:$0]  %s4704_s25, 16, %s123_s18, [#allocation8]  }
  0x4d   :  { %s4221_s1 = scalar_lea.vmem %s145_s23, 16  ;;  %s4225_s2 = scalar_lea.vmem %s145_s23, 32 }
  0x4e   :  { %p4222_p10 = scmp.ne.s32.totalorder %s145_s23, %s4221_s1  ;;  %p4226_p11 = scmp.lt.s32.totalorder %s145_s23, %s145_s23 }
  0x4f   :  { %p4227_p12 = scmp.lt.s32.totalorder %s4225_s2, %s4221_s1 }
  0x51   :  { %p4228_p13 = por %p4227_p12, %p4226_p11 }
  0x53   :  { %p4229_p0 = pnand %p4228_p13, %p4222_p10 }
  0x55   :  { %4232 = shalt.err (!%p4229_p0)
}
  0x56   :  { %147 = dma.hbm_to_vmem [thread:$0]  %s4719_s8, 16, %s145_s23, [#allocation11]  }
  0x57   :  { %s4649_s13 = smov [#allocation13]   ;;  %s4650_s10 = smov [#allocation16]  }
  0x58   :  { %s165_s7 = sshll.u32 %s4649_s13, 4  ;;  %s189_s11 = sshll.u32 %s4650_s10, 4  ;;  %s166_s7 = int_to_ptr.vmem [resolvable:$true] %s165_s7  ;;  %s190_s11 = int_to_ptr.vmem [resolvable:$true] %s189_s11 }
  0x59   :  { %s4241_s16 = scalar_lea.vmem %s166_s7, 384  ;;  %p4246_p2 = scmp.lt.s32.totalorder %s166_s7, %s166_s7 }
  0x5a   :  { %p4242_p1 = scmp.ne.s32.totalorder %s166_s7, %s4241_s16  ;;  %p4247_p3 = scmp.lt.s32.totalorder %s4241_s16, %s4241_s16 }
  0x5c   :  { %p4248_p4 = por %p4247_p3, %p4246_p2 }
  0x5e   :  { %p4249_p5 = pnand %p4248_p4, %p4242_p1 }
  0x60   :  { %4252 = shalt.err (!%p4249_p5)
}
  0x61   :  { %s4651_s25 = smov 128   ;;  %s4652_s18 = smov 8  }
  0x62   :  { %171 = dma.hbm_to_vmem [thread:$0]  %s4729_s19, 384, %s166_s7, [#allocation14], %s4651_s25, %s4651_s25, %s4652_s18  }
  0x63   :  { %s4261_s8 = scalar_lea.vmem %s190_s11, 2048  ;;  %p4266_p7 = scmp.lt.s32.totalorder %s190_s11, %s190_s11 }
  0x64   :  { %p4262_p6 = scmp.ne.s32.totalorder %s190_s11, %s4261_s8  ;;  %p4267_p8 = scmp.lt.s32.totalorder %s4261_s8, %s4261_s8 }
  0x66   :  { %p4268_p9 = por %p4267_p8, %p4266_p7 }
  0x68   :  { %p4269_p10 = pnand %p4268_p9, %p4262_p6 }
  0x6a   :  { %4272 = shalt.err (!%p4269_p10)
}
  0x6b   :  { %195 = dma.hbm_to_vmem [thread:$0]  %s4744_s6, 2048, %s190_s11, [#allocation17], %s4651_s25, %s4651_s25, %s4652_s18  }
  0x6c   :  { %s4653_s22 = smov [#allocation19]   ;;  %s4654_s26 = smov [#allocation22]  }
  0x6d   :  { %s213_s23 = sshll.u32 %s4653_s22, 4  ;;  %s238_s28 = sshll.u32 %s4654_s26, 4  ;;  %s214_s23 = int_to_ptr.vmem [resolvable:$true] %s213_s23  ;;  %s239_s28 = int_to_ptr.vmem [resolvable:$true] %s238_s28 }
  0x6e   :  { %s4281_s1 = scalar_lea.vmem %s214_s23, 768  ;;  %p4286_p12 = scmp.lt.s32.totalorder %s214_s23, %s214_s23 }
  0x6f   :  { %p4282_p11 = scmp.ne.s32.totalorder %s214_s23, %s4281_s1  ;;  %p4287_p13 = scmp.lt.s32.totalorder %s4281_s1, %s4281_s1 }
  0x71   :  { %p4288_p0 = por %p4287_p13, %p4286_p12 }
  0x73   :  { %p4289_p1 = pnand %p4288_p0, %p4282_p11 }
  0x75   :  { %4292 = shalt.err (!%p4289_p1)
}
  0x76   :  { %219 = dma.hbm_to_vmem [thread:$0]  %s4759_s27, 768, %s214_s23, [#allocation20], %s4651_s25, %s4651_s25, %s4652_s18  }
  0x77   :  { %s4301_s19 = scalar_lea.vmem %s239_s28, 16  ;;  %s4305_s6 = scalar_lea.vmem %s239_s28, 32 }
  0x78   :  { %p4302_p2 = scmp.ne.s32.totalorder %s239_s28, %s4301_s19  ;;  %p4306_p3 = scmp.lt.s32.totalorder %s239_s28, %s239_s28 }
  0x79   :  { %p4307_p4 = scmp.lt.s32.totalorder %s4305_s6, %s4301_s19 }
  0x7b   :  { %p4308_p5 = por %p4307_p4, %p4306_p3 }
  0x7d   :  { %p4309_p6 = pnand %p4308_p5, %p4302_p2 }
  0x7f   :  { %4312 = shalt.err (!%p4309_p6)
}
  0x80   :  { %241 = dma.hbm_to_vmem [thread:$0]  %s4769_s24, 16, %s239_s28, [#allocation23]  }
  0x81   :  { %s4655_s2 = smov [#allocation25]   ;;  %s4656_s7 = smov [#allocation28]  }
  0x82   :  { %s260_s13 = sshll.u32 %s4655_s2, 4  ;;  %s283_s10 = sshll.u32 %s4656_s7, 4  ;;  %s261_s13 = int_to_ptr.vmem [resolvable:$true] %s260_s13  ;;  %s284_s10 = int_to_ptr.vmem [resolvable:$true] %s283_s10 }
  0x83   :  { %s4321_s11 = scalar_lea.vmem %s261_s13, 16  ;;  %s4325_s16 = scalar_lea.vmem %s261_s13, 32 }
  0x84   :  { %p4322_p7 = scmp.ne.s32.totalorder %s261_s13, %s4321_s11  ;;  %p4326_p8 = scmp.lt.s32.totalorder %s261_s13, %s261_s13 }
  0x85   :  { %p4327_p9 = scmp.lt.s32.totalorder %s4325_s16, %s4321_s11 }
  0x87   :  { %p4328_p10 = por %p4327_p9, %p4326_p8 }
  0x89   :  { %p4329_p11 = pnand %p4328_p10, %p4322_p7 }
  0x8b   :  { %4332 = shalt.err (!%p4329_p11)
}
  0x8c   :  { %263 = dma.hbm_to_vmem [thread:$0]  %s4779_s17, 16, %s261_s13, [#allocation26]  }
  0x8d   :  { %s4341_s27 = scalar_lea.vmem %s284_s10, 3072  ;;  %p4346_p13 = scmp.lt.s32.totalorder %s284_s10, %s284_s10 }
  0x8e   :  { %p4342_p12 = scmp.ne.s32.totalorder %s284_s10, %s4341_s27  ;;  %p4347_p0 = scmp.lt.s32.totalorder %s4341_s27, %s4341_s27 }
  0x90   :  { %p4348_p1 = por %p4347_p0, %p4346_p13 }
  0x92   :  { %p4349_p2 = pnand %p4348_p1, %p4342_p12 }
  0x94   :  { %4352 = shalt.err (!%p4349_p2)
}
  0x95   :  { %289 = dma.hbm_to_vmem [thread:$0]  %s4794_s20, 3072, %s284_s10, [#allocation29], %s4645_s0, %s4645_s0, %s4646_s15  }
  0x96   :  { %s4657_s24 = smov [#allocation31]   ;;  %s4658_s22 = smov [#allocation2]  }
  0x97   :  { %s305_s8 = sshll.u32 %s4657_s24, 4  ;;  %s83_s23 = sshll.u32 %s4658_s22, 4  ;;  %s306_s8 = int_to_ptr.vmem [resolvable:$true] %s305_s8  ;;  %s84_s23 = int_to_ptr.vmem [resolvable:$true] %s83_s23 }
  0x98   :  { %s4361_s26 = scalar_lea.vmem %s306_s8, 2048  ;;  %p4366_p4 = scmp.lt.s32.totalorder %s306_s8, %s306_s8 }
  0x99   :  { %p4362_p3 = scmp.ne.s32.totalorder %s306_s8, %s4361_s26  ;;  %p4367_p5 = scmp.lt.s32.totalorder %s4361_s26, %s4361_s26 }
  0x9b   :  { %p4368_p6 = por %p4367_p5, %p4366_p4 }
  0x9d   :  { %p4369_p7 = pnand %p4368_p6, %p4362_p3 }
  0x9f   :  { %4372 = shalt.err (!%p4369_p7)
}
  0xa0   :  { %311 = dma.hbm_to_vmem [thread:$0]  %s4804_s29, 2048, %s306_s8, [#allocation32], %s4651_s25, %s4651_s25, %s4652_s18  }
  0xa1   :  { %s4381_s17 = scalar_lea.vmem %s84_s23, 768  ;;  %p4386_p9 = scmp.lt.s32.totalorder %s84_s23, %s84_s23 }
  0xa2   :  { %p4382_p8 = scmp.ne.s32.totalorder %s84_s23, %s4381_s17  ;;  %p4387_p10 = scmp.lt.s32.totalorder %s4381_s17, %s4381_s17 }
  0xa4   :  { %p4388_p11 = por %p4387_p10, %p4386_p9 }
  0xa6   :  { %p4389_p12 = pnand %p4388_p11, %p4382_p8 }
  0xa8   :  { %4392 = shalt.err (!%p4389_p12)
}
  0xa9   :  { %89 = dma.hbm_to_vmem [thread:$0]  %s4684_s9, 768, %s84_s23, [#allocation3], %s4651_s25, %s4651_s25, %s4652_s18  }
  0xaa   :  { %s4659_s20 = smov [#allocation6]   ;;  %s4660_s1 = smov [#allocation9]  }
  0xab   :  { %s109_s28 = sshll.u32 %s4659_s20, 4  ;;  %s134_s19 = sshll.u32 %s4660_s1, 4  ;;  %s110_s28 = int_to_ptr.vmem [resolvable:$true] %s109_s28  ;;  %s135_s19 = int_to_ptr.vmem [resolvable:$true] %s134_s19 }
  0xac   :  { %s4401_s6 = scalar_lea.vmem %s110_s28, 2048  ;;  %p4406_p0 = scmp.lt.s32.totalorder %s110_s28, %s110_s28 }
  0xad   :  { %p4402_p13 = scmp.ne.s32.totalorder %s110_s28, %s4401_s6  ;;  %p4407_p1 = scmp.lt.s32.totalorder %s4401_s6, %s4401_s6 }
  0xaf   :  { %p4408_p2 = por %p4407_p1, %p4406_p0 }
  0xb1   :  { %p4409_p3 = pnand %p4408_p2, %p4402_p13 }
  0xb3   :  { %4412 = shalt.err (!%p4409_p3)
}
  0xb4   :  { %115 = dma.hbm_to_vmem [thread:$0]  %s4699_s21, 2048, %s110_s28, [#allocation5], %s4651_s25, %s4651_s25, %s4652_s18  }
  0xb5   :  { %s4421_s29 = scalar_lea.vmem %s135_s19, 16  ;;  %s4425_s9 = scalar_lea.vmem %s135_s19, 32 }
  0xb6   :  { %p4422_p4 = scmp.ne.s32.totalorder %s135_s19, %s4421_s29  ;;  %p4426_p5 = scmp.lt.s32.totalorder %s135_s19, %s135_s19 }
  0xb7   :  { %p4427_p6 = scmp.lt.s32.totalorder %s4425_s9, %s4421_s29 }
  0xb9   :  { %p4428_p7 = por %p4427_p6, %p4426_p5 }
  0xbb   :  { %p4429_p8 = pnand %p4428_p7, %p4422_p4 }
  0xbd   :  { %4432 = shalt.err (!%p4429_p8)
}
  0xbe   :  { %137 = dma.hbm_to_vmem [thread:$0]  %s4714_s3, 16, %s135_s19, [#allocation8]  }
  0xbf   :  { %s4661_s2 = smov [#allocation12]   ;;  %s4662_s7 = smov [#allocation15]  }
  0xc0   :  { %s153_s13 = sshll.u32 %s4661_s2, 4  ;;  %s180_s10 = sshll.u32 %s4662_s7, 4  ;;  %s154_s13 = int_to_ptr.vmem [resolvable:$true] %s153_s13  ;;  %s181_s10 = int_to_ptr.vmem [resolvable:$true] %s180_s10 }
  0xc1   :  { %s4441_s11 = scalar_lea.vmem %s154_s13, 1024  ;;  %p4446_p10 = scmp.lt.s32.totalorder %s154_s13, %s154_s13 }
  0xc2   :  { %p4442_p9 = scmp.ne.s32.totalorder %s154_s13, %s4441_s11  ;;  %p4447_p11 = scmp.lt.s32.totalorder %s4441_s11, %s4441_s11 }
  0xc4   :  { %p4448_p12 = por %p4447_p11, %p4446_p10 }
  0xc6   :  { %p4449_p13 = pnand %p4448_p12, %p4442_p9 }
  0xc8   :  { %4452 = shalt.err (!%p4449_p13)
}
  0xc9   :  { %159 = dma.hbm_to_vmem [thread:$0]  %s4724_s14, 1024, %s154_s13, [#allocation11], %s4645_s0, %s4645_s0, %s4646_s15  }
  0xca   :  { %s4461_s21 = scalar_lea.vmem %s181_s10, 16  ;;  %s4465_s3 = scalar_lea.vmem %s181_s10, 32 }
  0xcb   :  { %p4462_p0 = scmp.ne.s32.totalorder %s181_s10, %s4461_s21  ;;  %p4466_p1 = scmp.lt.s32.totalorder %s181_s10, %s181_s10 }
  0xcc   :  { %p4467_p2 = scmp.lt.s32.totalorder %s4465_s3, %s4461_s21 }
  0xce   :  { %p4468_p3 = por %p4467_p2, %p4466_p1 }
  0xd0   :  { %p4469_p4 = pnand %p4468_p3, %p4462_p0 }
  0xd2   :  { %4472 = shalt.err (!%p4469_p4)
}
  0xd3   :  { %s5105_s16 = sld [smem:[#allocation49_spill]]  ;;  %s4663_s27 = smov [#allocation18]  }
  0xd4   :  { %s202_s24 = sshll.u32 %s4663_s27, 4  ;;  %s4664_s8 = smov [#allocation21]   ;;  %s203_s24 = int_to_ptr.vmem [resolvable:$true] %s202_s24 }
  0xd5   :  { %s225_s22 = sshll.u32 %s4664_s8, 4  ;;  %s4481_s23 = scalar_lea.vmem %s203_s24, 16  ;;  %s226_s22 = int_to_ptr.vmem [resolvable:$true] %s225_s22 }
  0xd6   :  { %p4482_p5 = scmp.ne.s32.totalorder %s203_s24, %s4481_s23  ;;  %s4485_s26 = scalar_lea.vmem %s203_s24, 32 }
  0xd7   :  { %p4486_p6 = scmp.lt.s32.totalorder %s203_s24, %s203_s24  ;;  %p4487_p7 = scmp.lt.s32.totalorder %s4485_s26, %s4481_s23 }
  0xd9   :  { %183 = dma.hbm_to_vmem [thread:$0]  %s5105_s16, 16, %s181_s10, [#allocation14]  }
  0xda   :  { %p4488_p8 = por %p4487_p7, %p4486_p6 }
  0xdc   :  { %p4489_p9 = pnand %p4488_p8, %p4482_p5 }
  0xde   :  { %4492 = shalt.err (!%p4489_p9)
}
  0xdf   :  { %s5106_s14 = sld [smem:[#allocation50_spill]]  ;;  %s4501_s17 = scalar_lea.vmem %s226_s22, 3072 }
  0xe0   :  { %p4502_p10 = scmp.ne.s32.totalorder %s226_s22, %s4501_s17  ;;  %p4506_p11 = scmp.lt.s32.totalorder %s226_s22, %s226_s22 }
  0xe1   :  { %p4507_p12 = scmp.lt.s32.totalorder %s4501_s17, %s4501_s17 }
  0xe3   :  { %p4508_p13 = por %p4507_p12, %p4506_p11 }
  0xe5   :  { %205 = dma.hbm_to_vmem [thread:$0]  %s5106_s14, 16, %s203_s24, [#allocation17]  }
  0xe6   :  { %p4509_p0 = pnand %p4508_p13, %p4502_p10 }
  0xe8   :  { %4512 = shalt.err (!%p4509_p0)
}
  0xe9   :  { %s5107_s20 = sld [smem:[#allocation52_spill]]  ;;  %s4665_s28 = smov [#allocation24]  }
  0xea   :  { %s247_s1 = sshll.u32 %s4665_s28, 4  ;;  %s4666_s19 = smov [#allocation27]   ;;  %s248_s1 = int_to_ptr.vmem [resolvable:$true] %s247_s1 }
  0xeb   :  { %s271_s6 = sshll.u32 %s4666_s19, 4  ;;  %s4521_s29 = scalar_lea.vmem %s248_s1, 2048  ;;  %s272_s6 = int_to_ptr.vmem [resolvable:$true] %s271_s6 }
  0xec   :  { %p4522_p1 = scmp.ne.s32.totalorder %s248_s1, %s4521_s29  ;;  %p4526_p2 = scmp.lt.s32.totalorder %s248_s1, %s248_s1 }
  0xed   :  { %p4527_p3 = scmp.lt.s32.totalorder %s4521_s29, %s4521_s29 }
  0xef   :  { %231 = dma.hbm_to_vmem [thread:$0]  %s5107_s20, 3072, %s226_s22, [#allocation20], %s4645_s0, %s4645_s0, %s4646_s15  }
  0xf0   :  { %p4528_p4 = por %p4527_p3, %p4526_p2 }
  0xf2   :  { %p4529_p5 = pnand %p4528_p4, %p4522_p1 }
  0xf4   :  { %4532 = shalt.err (!%p4529_p5)
}
  0xf5   :  { %s5108_s9 = sld [smem:[#allocation53_spill]]  ;;  %s4541_s2 = scalar_lea.vmem %s272_s6, 1536 }
  0xf6   :  { %p4542_p6 = scmp.ne.s32.totalorder %s272_s6, %s4541_s2  ;;  %p4546_p7 = scmp.lt.s32.totalorder %s272_s6, %s272_s6 }
  0xf7   :  { %p4547_p8 = scmp.lt.s32.totalorder %s4541_s2, %s4541_s2 }
  0xf9   :  { %p4548_p9 = por %p4547_p8, %p4546_p7 }
  0xfb   :  { %253 = dma.hbm_to_vmem [thread:$0]  %s5108_s9, 2048, %s248_s1, [#allocation23], %s4651_s25, %s4651_s25, %s4652_s18  }
  0xfc   :  { %p4549_p10 = pnand %p4548_p9, %p4542_p6 }
  0xfe   :  { %4552 = shalt.err (!%p4549_p10)
}
  0xff   :  { %s5109_s0 = sld [smem:[#allocation55_spill]]  ;;  %s4667_s15 = smov [#allocation30]  }
 0x100   :  { %s296_s13 = sshll.u32 %s4667_s15, 4  ;;  %s4668_s7 = smov [#allocation33]   ;;  %s297_s13 = int_to_ptr.vmem [resolvable:$true] %s296_s13 }
 0x101   :  { %s318_s10 = sshll.u32 %s4668_s7, 4  ;;  %s4561_s11 = scalar_lea.vmem %s297_s13, 16  ;;  %s319_s10 = int_to_ptr.vmem [resolvable:$true] %s318_s10 }
 0x102   :  { %p4562_p11 = scmp.ne.s32.totalorder %s297_s13, %s4561_s11  ;;  %s4565_s21 = scalar_lea.vmem %s297_s13, 32 }
 0x103   :  { %p4566_p12 = scmp.lt.s32.totalorder %s297_s13, %s297_s13  ;;  %p4567_p13 = scmp.lt.s32.totalorder %s4565_s21, %s4561_s11 }
 0x105   :  { %277 = dma.hbm_to_vmem [thread:$0]  %s5109_s0, 1536, %s272_s6, [#allocation26], %s4651_s25, %s4651_s25, %s4652_s18  }
 0x106   :  { %p4568_p0 = por %p4567_p13, %p4566_p12 }
 0x108   :  { %p4569_p1 = pnand %p4568_p0, %p4562_p11 }
 0x10a   :  { %4572 = shalt.err (!%p4569_p1)
}
 0x10b   :  { %s5110_s3 = sld [smem:[#allocation56_spill]]  ;;  %s4581_s16 = scalar_lea.vmem %s319_s10, 16 }
 0x10c   :  { %p4582_p2 = scmp.ne.s32.totalorder %s319_s10, %s4581_s16  ;;  %s4585_s27 = scalar_lea.vmem %s319_s10, 32 }
 0x10d   :  { %p4586_p3 = scmp.lt.s32.totalorder %s319_s10, %s319_s10  ;;  %p4587_p4 = scmp.lt.s32.totalorder %s4585_s27, %s4581_s16 }
 0x10f   :  { %p4588_p5 = por %p4587_p4, %p4586_p3 }
 0x111   :  { %299 = dma.hbm_to_vmem [thread:$0]  %s5110_s3, 16, %s297_s13, [#allocation29]  }
 0x112   :  { %p4589_p6 = pnand %p4588_p5, %p4582_p2 }
 0x114   :  { %4592 = shalt.err (!%p4589_p6)
}
 0x115   :  { %321 = dma.hbm_to_vmem [thread:$0]  %s4809_s5, 16, %s319_s10, [#allocation32]  }
 0x116   :  { %4593 = dma.done.wait [#allocation3], 768  }
 0x117   :  { %4594 = vsyncadd [#allocation3], 4294966528 }
 0x118   :  { %4595 = dma.done.wait [#allocation5], 5120  }
 0x119   :  { %4596 = vsyncadd [#allocation5], 4294962176 }
 0x11a   :  { %4597 = dma.done.wait [#allocation8], 32  }
 0x11b   :  { %4598 = vsyncadd [#allocation8], 4294967264 }
 0x11c   :  { %4599 = dma.done.wait [#allocation11], 1040  }
 0x11d   :  { %4600 = vsyncadd [#allocation11], 4294966256 }
 0x11e   :  { %4601 = dma.done.wait [#allocation14], 400  }
 0x11f   :  { %4602 = vsyncadd [#allocation14], 4294966896 }
 0x120   :  { %4603 = dma.done.wait [#allocation17], 2064  }
 0x121   :  { %4604 = vsyncadd [#allocation17], 4294965232 }
 0x122   :  { %4605 = dma.done.wait [#allocation20], 3840  }
 0x123   :  { %4606 = vsyncadd [#allocation20], 4294963456 }
 0x124   :  { %4607 = dma.done.wait [#allocation23], 2064  }
 0x125   :  { %4608 = vsyncadd [#allocation23], 4294965232 }
 0x126   :  { %4609 = dma.done.wait [#allocation26], 1552  }
 0x127   :  { %4610 = vsyncadd [#allocation26], 4294965744 }
 0x128   :  { %4611 = dma.done.wait [#allocation29], 3088  }
 0x129   :  { %4612 = vsyncadd [#allocation29], 4294964208 }
 0x12a   :  { %4613 = dma.done.wait [#allocation32], 2064  }
 0x12b   :  { %4614 = vsyncadd [#allocation32], 4294965232  ;;  %s5111_s5 = sld [smem:[#allocation45_spill]]  ;;  %vm394_vm0 = vcmask 261120   ;;  %v392_v2 = vld [vmem:[#allocation2] sm:$0xff]  ;;  %v393_v5 = vld [vmem:[#allocation2 + $0x8] sm:$0xff] }
 0x12c   :  { %3680 = vmatprep.mubr.msk.f32.mxu1 %vm394_vm0, %v392_v2  ;;  %v559_v6 = vld [vmem:[#allocation2 + $0x20] sm:$0xff]  ;;  %v476_v7 = vld [vmem:[#allocation2 + $0x10] sm:$0xff]  ;;  %v560_v8 = vld [vmem:[#allocation2 + $0x28] sm:$0xff]  ;;  %v4669_v16 = vmov 0.0   ;;  %vm4670_vm1 = vmmov 0   ;;  %s5112_s25 = sld [smem:[#allocation47_spill]] }
 0x12d   :  { %v4068_v9 = vld [vmem:[#allocation4 + $0x78] sm:$0xff]   ;;  %3702 = vmatprep.mubr.msk.f32.mxu0 %vm394_vm0, %v559_v6  ;;  %v477_v11 = vld [vmem:[#allocation2 + $0x18] sm:$0xff]  ;;  %v4071_v12 = vld [vmem:[#allocation4 + $0x70] sm:$0xff]   ;;  %s5113_s18 = sld [smem:[#allocation46_spill]]  ;;  %vm1207_vm4 = vcmask 130048   ;;  %vm1827_vm5 = vcmask 64512  }
 0x12e   :  { %v4069_v10 = vld [vmem:[#allocation4 + $0x38] sm:$0xff]   ;;  %v4072_v14 = vld [vmem:[#allocation4 + $0x30] sm:$0xff]   ;;  %v4074_v15 = vld [vmem:[#allocation4 + $0x68] sm:$0xff]   ;;  %s5114_s24 = sld [smem:[#allocation48_spill]] }
 0x12f   :  { %v709_v13 = vld [vmem:[#allocation6 + $0x78] sm:$0xff]  ;;  %v708_v17 = vld [vmem:[#allocation6 + $0x70] sm:$0xff]  ;;  %v707_v18 = vld [vmem:[#allocation6 + $0x68] sm:$0xff]  ;;  %s5115_s8 = sld [smem:[#allocation51_spill]] }
 0x130   :  { %v706_v19 = vld [vmem:[#allocation6 + $0x60] sm:$0xff]  ;;  %v4075_v20 = vld [vmem:[#allocation4 + $0x28] sm:$0xff]   ;;  %v705_v22 = vld [vmem:[#allocation6 + $0x58] sm:$0xff] }
 0x131   :  { %v391_v0 = vld [vmem:[%s5111_s5 + $0x18] sm:$0xff]  ;;  %v390_v1 = vld [vmem:[%s5111_s5 + $0x10] sm:$0xff]  ;;  %v389_v3 = vld [vmem:[%s5111_s5 + $0x8] sm:$0xff] }
 0x132   :  { %3672 = vmatprep.subr.mxu1 %v391_v0  ;;  %3694 = vmatprep.subr.mxu0 %v391_v0  ;;  %v388_v4 = vld [vmem:[%s5111_s5] sm:$0xff]  ;;  %v4077_v21 = vld [vmem:[#allocation4 + $0x60] sm:$0xff]   ;;  %v4080_v25 = vld [vmem:[#allocation4 + $0x58] sm:$0xff]  }
 0x133   :  { %3673 = vmatpush3.msra.mxu1 %v391_v0  ;;  %3695 = vmatpush3.msra.mxu0 %v391_v0  ;;  %v4078_v23 = vld [vmem:[#allocation4 + $0x20] sm:$0xff]   ;;  %v704_v24 = vld [vmem:[#allocation6 + $0x50] sm:$0xff]  ;;  %v703_v26 = vld [vmem:[#allocation6 + $0x48] sm:$0xff] }
 0x134   :  { %3674 = vmatprep.subr.mxu1 %v390_v1  ;;  %3696 = vmatprep.subr.mxu0 %v390_v1  ;;  %v4081_v27 = vld [vmem:[#allocation4 + $0x18] sm:$0xff]   ;;  %v702_v28 = vld [vmem:[#allocation6 + $0x40] sm:$0xff]  ;;  %v700_v30 = vld [vmem:[#allocation6 + $0x30] sm:$0xff] }
 0x135   :  { %3675 = vmatpush3.msra.mxu1 %v390_v1  ;;  %3697 = vmatpush3.msra.mxu0 %v390_v1  ;;  %v701_v29 = vld [vmem:[#allocation6 + $0x38] sm:$0xff]  ;;  %v699_v31 = vld [vmem:[#allocation6 + $0x28] sm:$0xff]  ;;  %v698_v32 = vld [vmem:[#allocation6 + $0x20] sm:$0xff] }
 0x136   :  { %3676 = vmatprep.subr.mxu1 %v389_v3  ;;  %3698 = vmatprep.subr.mxu0 %v389_v3  ;;  %v697_v33 = vld [vmem:[#allocation6 + $0x18] sm:$0xff]  ;;  %v696_v34 = vld [vmem:[#allocation6 + $0x10] sm:$0xff]  ;;  %v695_v35 = vld [vmem:[#allocation6 + $0x8] sm:$0xff] }
 0x137   :  { %3677 = vmatpush3.msra.mxu1 %v389_v3  ;;  %3699 = vmatpush3.msra.mxu0 %v389_v3  ;;  %v694_v36 = vld [vmem:[#allocation6] sm:$0xff]  ;;  %v693_v37 = vld [vmem:[%s5112_s25] sm:$0x3]  ;;  %v4067_v38 = vld [vmem:[#allocation4 + $0xb8] sm:$0xff]  }
 0x138   :  { %3678 = vmatprep.subr.mxu1 %v388_v4  ;;  %3700 = vmatprep.subr.mxu0 %v388_v4  ;;  %v4070_v39 = vld [vmem:[#allocation4 + $0xb0] sm:$0xff]   ;;  %v4073_v40 = vld [vmem:[#allocation4 + $0xa8] sm:$0xff]   ;;  %v4076_v41 = vld [vmem:[#allocation4 + $0xa0] sm:$0xff]  }
 0x139   :  { %3679 = vmatpush3.msra.mxu1 %v388_v4  ;;  %3701 = vmatpush3.msra.mxu0 %v388_v4  ;;  %v4079_v42 = vld [vmem:[#allocation4 + $0x98] sm:$0xff]   ;;  %v4082_v43 = vld [vmem:[#allocation4 + $0x90] sm:$0xff]   ;;  %v4085_v46 = vld [vmem:[#allocation4 + $0x88] sm:$0xff]  }
 0x13a   :  { %3681 = vmatmul.mubr.msk.f32.vlgmr.msra.gmra.mxu1 %vm394_vm0, %v393_v5  ;;  %3683 = vmatprep.subr.mxu1 %v391_v0  ;;  %v4083_v44 = vld [vmem:[#allocation4 + $0x50] sm:$0xff]   ;;  %v4086_v47 = vld [vmem:[#allocation4 + $0x48] sm:$0xff]   ;;  %v4088_v49 = vld [vmem:[#allocation4 + $0x80] sm:$0xff]  }
 0x13b   :  { %3684 = vmatpush3.msra.mxu1 %v391_v0  ;;  %3691 = vmatprep.mubr.msk.f32.mxu1 %vm394_vm0, %v476_v7  ;;  %v4084_v45 = vld [vmem:[#allocation4 + $0x10] sm:$0xff]   ;;  %v4087_v48 = vld [vmem:[#allocation4 + $0x8] sm:$0xff]   ;;  %v4089_v50 = vld [vmem:[#allocation4 + $0x40] sm:$0xff]  }
 0x13c   :  { %3685 = vmatprep.subr.mxu1 %v390_v1  ;;  %3703 = vmatmul.mubr.msk.f32.vlgmr.msra.gmra.mxu0 %vm394_vm0, %v560_v8  ;;  %v4090_v51 = vld [vmem:[#allocation4] sm:$0xff]   ;;  %v4092_v0 = vld [vmem:[#allocation12 + $0x30] sm:$0xff]   ;;  %v4097_v5 = vld [vmem:[#allocation12 + $0x8] sm:$0xff]   ;;  %v788_v8 = vlaneseq }
 0x13d   :  { %3686 = vmatpush3.msra.mxu1 %v390_v1  ;;  %3445 = vmatprep.subr.bf16.mxu0 %v4068_v9  ;;  %v4091_v63 = vld [vmem:[#allocation12 + $0x38] sm:$0xff]   ;;  %v4093_v1 = vld [vmem:[#allocation12 + $0x28] sm:$0xff]   ;;  %v4094_v2 = vld [vmem:[#allocation12 + $0x20] sm:$0xff]  }
 0x13e   :  { %3687 = vmatprep.subr.mxu1 %v389_v3  ;;  %3446 = vmatpush3.bf16.msra.mxu0 %v4069_v10  ;;  %v4098_v6 = vld [vmem:[#allocation12] sm:$0xff]   ;;  %v3275_v10 = vld [vmem:[#allocation7] ss:$0 sm:$0xff] }
 0x13f   :  { %3688 = vmatpush3.msra.mxu1 %v389_v3  ;;  %3447 = vmatprep.subr.bf16.mxu0 %v4071_v12  ;;  %v4095_v3 = vld [vmem:[#allocation12 + $0x18] sm:$0xff]  }
 0x140   :  { %3689 = vmatprep.subr.mxu1 %v388_v4 }
 0x141   :  { %3690 = vmatpush3.msra.mxu1 %v388_v4  ;;  %v4096_v4 = vld [vmem:[#allocation12 + $0x10] sm:$0xff]  }
 0x142   :  { %3692 = vmatmul.mubr.msk.f32.vlgmr.msra.gmra.mxu1 %vm394_vm0, %v477_v11  ;;  %3705 = vmatprep.subr.mxu1 %v4669_v16 }
 0x143   :  { %3706 = vmatpush3.msra.mxu1 %v709_v13  ;;  %3737 = vmatprep.mubr.msk.f32.mxu1 %vm4670_vm1, %v4669_v16 }
 0x144   :  { %3707 = vmatprep.subr.mxu1 %v4669_v16  ;;  %3448 = vmatpush3.bf16.msra.mxu0 %v4072_v14  ;;  %v4936_v14 = vshrl.u32 %v788_v8, 7 }
 0x145   :  { %3708 = vmatpush3.msra.mxu1 %v708_v17  ;;  %3449 = vmatprep.subr.bf16.mxu0 %v4074_v15  ;;  %v3276_v17 = vld [vmem:[%s5113_s18] ss:$0 sm:$0xff] }
 0x146   :  { %3709 = vmatprep.subr.mxu1 %v4669_v16  ;;  %vm1575_vm6 = vcmp.lt.s32.totalorder %v4936_v14, 4  ;;  %vm1582_vm7 = vcmp.ge.s32.totalorder %v4936_v14, 4 }
 0x147   :  { %3710 = vmatpush3.msra.mxu1 %v707_v18 }
 0x148   :  { %3711 = vmatprep.subr.mxu1 %v4669_v16  ;;  %3450 = vmatpush3.bf16.msra.mxu0 %v4075_v20 }
 0x149   :  { %3712 = vmatpush3.msra.mxu1 %v706_v19  ;;  %3451 = vmatprep.subr.bf16.mxu0 %v4077_v21 }
 0x14a   :  { %3713 = vmatprep.subr.mxu1 %v4669_v16 }
 0x14b   :  { %3714 = vmatpush3.msra.mxu1 %v705_v22  ;;  %v4940_v22 = vsub.s32 0, %v4936_v14 }
 0x14c   :  { %3715 = vmatprep.subr.mxu1 %v4669_v16  ;;  %3452 = vmatpush3.bf16.msra.mxu0 %v4078_v23 }
 0x14d   :  { %3716 = vmatpush3.msra.mxu1 %v704_v24  ;;  %3453 = vmatprep.subr.bf16.mxu0 %v4080_v25  ;;  %v4943_v25 = vsub.s32 1, %v4936_v14  ;;  %v1910_v14 = vld [vmem:[#allocation19 + $0x18] sm:$0xff] }
 0x14e   :  { %3717 = vmatprep.subr.mxu1 %v4669_v16 }
 0x14f   :  { %3718 = vmatpush3.msra.mxu1 %v703_v26 }
 0x150   :  { %3719 = vmatprep.subr.mxu1 %v4669_v16  ;;  %3454 = vmatpush3.bf16.msra.mxu0 %v4081_v27 }
 0x151   :  { %3720 = vmatpush3.msra.mxu1 %v702_v28  ;;  %3455 = vmatprep.subr.bf16.mxu0 %v4083_v44 }
 0x152   :  { %3721 = vmatprep.subr.mxu1 %v4669_v16 }
 0x153   :  { %3722 = vmatpush3.msra.mxu1 %v701_v29 }
 0x154   :  { %3723 = vmatprep.subr.mxu1 %v4669_v16  ;;  %3456 = vmatpush3.bf16.msra.mxu0 %v4084_v45 }
 0x155   :  { %3724 = vmatpush3.msra.mxu1 %v700_v30  ;;  %3457 = vmatprep.subr.bf16.mxu0 %v4086_v47 }
 0x156   :  { %3725 = vmatprep.subr.mxu1 %v4669_v16 }
 0x157   :  { %3726 = vmatpush3.msra.mxu1 %v699_v31 }
 0x158   :  { %3727 = vmatprep.subr.mxu1 %v4669_v16  ;;  %3458 = vmatpush3.bf16.msra.mxu0 %v4087_v48 }
 0x159   :  { %3728 = vmatpush3.msra.mxu1 %v698_v32  ;;  %3459 = vmatprep.subr.bf16.mxu0 %v4089_v50 }
 0x15a   :  { %3729 = vmatprep.subr.mxu1 %v4669_v16 }
 0x15b   :  { %3730 = vmatpush3.msra.mxu1 %v697_v33 }
 0x15c   :  { %3731 = vmatprep.subr.mxu1 %v4669_v16  ;;  %3460 = vmatpush3.bf16.msra.mxu0 %v4090_v51 }
 0x15d   :  { %3732 = vmatpush3.msra.mxu1 %v696_v34  ;;  %3760 = vmatprep.subr.bf16.mxu0 %v4669_v16 }
 0x15e   :  { %3733 = vmatprep.subr.mxu1 %v4669_v16 }
 0x15f   :  { %3734 = vmatpush3.msra.mxu1 %v695_v35 }
 0x160   :  { %3735 = vmatprep.subr.mxu1 %v4669_v16 }
 0x161   :  { %3736 = vmatpush3.msra.mxu1 %v694_v36 }
 0x162   :  { %3740 = vmatprep.subr.bf16.mxu1 %v4669_v16  ;;  %3738 = vmatmul.mubr.f32.vlgmr.msra.gmra.mxu1 %v693_v37 }
 0x163   :  { %3741 = vmatpush3.bf16.msra.mxu1 %v4067_v38  ;;  %3756 = vmatprep.mubr.msk.bf16.mxu1 %vm4670_vm1, %v4669_v16 }
 0x164   :  { %3742 = vmatprep.subr.bf16.mxu1 %v4669_v16 }
 0x167   :  { %3743 = vmatpush3.bf16.msra.mxu1 %v4070_v39 }
 0x168   :  { %3744 = vmatprep.subr.bf16.mxu1 %v4669_v16 }
 0x16b   :  { %3745 = vmatpush3.bf16.msra.mxu1 %v4073_v40 }
 0x16c   :  { %3746 = vmatprep.subr.bf16.mxu1 %v4669_v16 }
 0x16f   :  { %3747 = vmatpush3.bf16.msra.mxu1 %v4076_v41 }
 0x170   :  { %3748 = vmatprep.subr.bf16.mxu1 %v4669_v16 }
 0x173   :  { %3749 = vmatpush3.bf16.msra.mxu1 %v4079_v42 }
 0x174   :  { %3750 = vmatprep.subr.bf16.mxu1 %v4669_v16 }
 0x177   :  { %3751 = vmatpush3.bf16.msra.mxu1 %v4082_v43 }
 0x178   :  { %3752 = vmatprep.subr.bf16.mxu1 %v4669_v16 }
 0x17b   :  { %3753 = vmatpush3.bf16.msra.mxu1 %v4085_v46 }
 0x17c   :  { %3754 = vmatprep.subr.bf16.mxu1 %v4669_v16 }
 0x17f   :  { %3755 = vmatpush3.bf16.msra.mxu1 %v4088_v49 }
 0x180   :  { %3780 = vmatprep.subr.mxu1 %v4669_v16 }
 0x1fa   :  { %v3682_v52 = vpop.f32.mrf.mxu1 }
 0x1fc   :  { %v3704_v53 = vpop.f32.mrf.mxu0  ;;  %v467_v54 = vpop.f32.mrf.mxu1 }
 0x1fd   :  { %v642_v60 = vpack.c.bf16 %v3682_v52, %v467_v54 }
 0x1fe   :  { %v633_v55 = vpop.f32.mrf.mxu0 }
 0x1ff   :  { %v644_v56 = vpack.c.bf16 %v3704_v53, %v633_v55 }
 0x201   :  { %3757 = vmatmul.mubr.bf16.vlgmr.msra.gmra.mxu1 %v644_v56 }
 0x202   :  { %v3693_v57 = vpop.f32.mrf.mxu1  ;;  %3784 = vmatprep.mubr.msk.f32.mxu1 %vm4670_vm1, %v4669_v16 }
 0x204   :  { %v550_v58 = vpop.f32.mrf.mxu1 }
 0x205   :  { %v643_v59 = vpack.c.bf16 %v3693_v57, %v550_v58  ;;  %v3301_v58 = vld [vmem:[#allocation9] ss:$0 sm:$0xff] }
 0x207   :  { %998 = vmatprep.mubr.bf16.mxu0 %v643_v59 }
 0x208   :  { %999 = vmatmul.mubr.bf16.vlgmr.msra.gmra.mxu0 %v642_v60 }
 0x209   :  { %3776 = vmatprep.mubr.msk.bf16.mxu0 %vm4670_vm1, %v4669_v16  ;;  %3761 = vmatpush3.bf16.msra.mxu0 %v4091_v63 }
 0x20a   :  { %3762 = vmatprep.subr.bf16.mxu0 %v4669_v16 }
 0x20d   :  { %3763 = vmatpush3.bf16.msra.mxu0 %v4092_v0 }
 0x20e   :  { %3764 = vmatprep.subr.bf16.mxu0 %v4669_v16 }
 0x211   :  { %3765 = vmatpush3.bf16.msra.mxu0 %v4093_v1 }
 0x212   :  { %3766 = vmatprep.subr.bf16.mxu0 %v4669_v16 }
 0x215   :  { %3767 = vmatpush3.bf16.msra.mxu0 %v4094_v2 }
 0x216   :  { %3768 = vmatprep.subr.bf16.mxu0 %v4669_v16 }
 0x219   :  { %3769 = vmatpush3.bf16.msra.mxu0 %v4095_v3 }
 0x21a   :  { %3770 = vmatprep.subr.bf16.mxu0 %v4669_v16 }
 0x21d   :  { %3771 = vmatpush3.bf16.msra.mxu0 %v4096_v4 }
 0x21e   :  { %3772 = vmatprep.subr.bf16.mxu0 %v4669_v16 }
 0x221   :  { %3773 = vmatpush3.bf16.msra.mxu0 %v4097_v5 }
 0x222   :  { %v783_v61 = vpop.f32.mrf.mxu1  ;;  %3774 = vmatprep.subr.bf16.mxu0 %v4669_v16 }
 0x223   :  { %v784_v13 = vadd.f32 %v3275_v10, %v783_v61  ;;  %v3302_v61 = vld [vmem:[#allocation10] ss:$0 sm:$0xff]  ;;  %v1206_v10 = vld [vmem:[#allocation13] sm:$0xff] }
 0x224   :  { %v3739_v62 = vpop.f32.mrf.mxu1 }
 0x225   :  { %3775 = vmatpush3.bf16.msra.mxu0 %v4098_v6  ;;  %v787_v21 = vmul.f32 0.01, %v784_v13  ;;  %v4099_v13 = vld [vmem:[%s5114_s24 + $0x78] sm:$0xff]  }
 0x226   :  { %3794 = vmatprep.subr.mxu0 %v4669_v16 }
 0x227   :  { %v800_v28 = vrot.slane %v787_v21, %v4940_v22  ;;  %v812_v30 = vrot.slane %v787_v21, %v4943_v25  ;;  %v1494_v21 = vld [vmem:[#allocation16 + $0x68] sm:$0xff] }
 0x2c1   :  { %v1041_v7 = vpop.f32.mrf.mxu1 }
 0x2c3   :  { %v3758_v9 = vpop.f32.mrf.mxu1 }
 0x2c5   :  { %v1044_v11 = vpop.f32.mrf.mxu1 }
 0x2c7   :  { %v3759_v15 = vpop.f32.mrf.mxu1 }
 0x2c8   :  { %v3461_v12 = vpop.f32.mrf.mxu0  ;;  %v1281_v15 = vld [vmem:[#allocation13 + $0x8] sm:$0xff] }
 0x2ca   :  { %v3462_v18 = vpop.f32.mrf.mxu0 }
 0x2cb   :  { %v3463_v19 = vadd.f32 %v3462_v18, %v3461_v12  ;;  %v1355_v12 = vld [vmem:[#allocation13 + $0x10] sm:$0xff]  ;;  %v4100_v18 = vld [vmem:[%s5114_s24 + $0x38] sm:$0xff]  }
 0x2cc   :  { %v3464_v20 = vpop.f32.mrf.mxu0 }
 0x2cd   :  { %v1001_v23 = vadd.f32 %v3463_v19, %v3276_v17  ;;  %v4102_v19 = vld [vmem:[%s5114_s24 + $0x70] sm:$0xff]  }
 0x2ce   :  { %v3465_v24 = vpop.f32.mrf.mxu0 }
 0x2cf   :  { %v1042_v26 = vadd.f32 %v1041_v7, %v1001_v23  ;;  %v3466_v27 = vadd.f32 %v3465_v24, %v3464_v20  ;;  %v1495_v20 = vld [vmem:[#allocation16 + $0x70] sm:$0xff]  ;;  %v4103_v23 = vld [vmem:[%s5114_s24 + $0x30] sm:$0xff]   ;;  %v4105_v24 = vld [vmem:[%s5114_s24 + $0x68] sm:$0xff]  }
 0x2d1   :  { %v1004_v29 = vadd.f32 %v3466_v27, %v3276_v17  ;;  %v1048_v31 = vadd.f32 %v1042_v26, %v800_v28  ;;  %v1496_v17 = vld [vmem:[#allocation16 + $0x78] sm:$0xff]  ;;  %v1493_v26 = vld [vmem:[#allocation16 + $0x60] sm:$0xff] }
 0x2d2   :  { %v1492_v27 = vld [vmem:[#allocation16 + $0x58] sm:$0xff] }
 0x2d3   :  { %v1045_v32 = vadd.f32 %v1044_v11, %v1004_v29  ;;  %v1058_v34 = vmul.f32 %v1048_v31, %v1048_v31  ;;  %v4106_v28 = vld [vmem:[%s5114_s24 + $0x28] sm:$0xff]   ;;  %v4108_v29 = vld [vmem:[%s5114_s24 + $0x60] sm:$0xff]  }
 0x2d5   :  { %v1049_v33 = vadd.f32 %v1045_v32, %v812_v30  ;;  %v1491_v30 = vld [vmem:[#allocation16 + $0x50] sm:$0xff] }
 0x2d6   :  { %v4109_v32 = vld [vmem:[%s5114_s24 + $0x20] sm:$0xff]  }
 0x2d7   :  { %v1050_v35 = vadd.f32 %v1049_v33, %v1048_v31  ;;  %v1059_v36 = vmul.f32 %v1049_v33, %v1049_v33 }
 0x2d9   :  { %v1051_v37 = vrot.slane %v1050_v35, 4  ;;  %v1060_v38 = vadd.f32 %v1059_v36, %v1058_v34  ;;  %v1489_v34 = vld [vmem:[#allocation16 + $0x40] sm:$0xff]  ;;  %v4112_v36 = vld [vmem:[%s5114_s24 + $0x18] sm:$0xff]  }
 0x2db   :  { %v1052_v39 = vadd.f32 %v1051_v37, %v1050_v35  ;;  %v1061_v40 = vrot.slane %v1060_v38, 4  ;;  %v1488_v35 = vld [vmem:[#allocation16 + $0x38] sm:$0xff]  ;;  %v4114_v37 = vld [vmem:[%s5114_s24 + $0x50] sm:$0xff]  }
 0x2dd   :  { %v1053_v41 = vrot.slane %v1052_v39, 2  ;;  %v1062_v42 = vadd.f32 %v1061_v40, %v1060_v38  ;;  %v1487_v38 = vld [vmem:[#allocation16 + $0x30] sm:$0xff]  ;;  %v4115_v40 = vld [vmem:[%s5114_s24 + $0x10] sm:$0xff]  }
 0x2df   :  { %v1054_v43 = vadd.f32 %v1053_v41, %v1052_v39  ;;  %v1063_v44 = vrot.slane %v1062_v42, 2  ;;  %v1486_v39 = vld [vmem:[#allocation16 + $0x28] sm:$0xff]  ;;  %v1485_v41 = vld [vmem:[#allocation16 + $0x20] sm:$0xff] }
 0x2e1   :  { %v1055_v45 = vrot.slane %v1054_v43, 1  ;;  %v1064_v46 = vadd.f32 %v1063_v44, %v1062_v42  ;;  %v1484_v42 = vld [vmem:[#allocation16 + $0x18] sm:$0xff]  ;;  %v1482_v44 = vld [vmem:[#allocation16 + $0x8] sm:$0xff] }
 0x2e3   :  { %v1056_v47 = vadd.f32 %v1055_v45, %v1054_v43  ;;  %v1065_v48 = vrot.slane %v1064_v46, 1  ;;  %v1483_v43 = vld [vmem:[#allocation16 + $0x10] sm:$0xff]  ;;  %v1481_v45 = vld [vmem:[#allocation16] sm:$0xff] }
 0x2e5   :  { %v1057_v49 = vmul.f32 0.0625, %v1056_v47  ;;  %v1066_v50 = vadd.f32 %v1065_v48, %v1064_v46  ;;  %v1480_v46 = vld [vmem:[%s5115_s8] sm:$0x3]  ;;  %v4101_v47 = vld [vmem:[%s5114_s24 + $0xb8] sm:$0xff]   ;;  %v4104_v48 = vld [vmem:[%s5114_s24 + $0xb0] sm:$0xff]  }
 0x2e7   :  { %v1067_v51 = vmul.f32 0.0625, %v1066_v50  ;;  %v1068_v52 = vmul.f32 %v1057_v49, %v1057_v49  ;;  %v1071_v55 = vsub.f32 %v1049_v33, %v1057_v49  ;;  %v1070_v56 = vsub.f32 %v1048_v31, %v1057_v49  ;;  %v1490_v31 = vld [vmem:[#allocation16 + $0x48] sm:$0xff]  ;;  %v4107_v49 = vld [vmem:[%s5114_s24 + $0xa8] sm:$0xff]   ;;  %v4110_v50 = vld [vmem:[%s5114_s24 + $0xa0] sm:$0xff]  }
 0x2e8   :  { %v4111_v33 = vld [vmem:[%s5114_s24 + $0x58] sm:$0xff]  }
 0x2e9   :  { %v1069_v53 = vsub.f32 %v1067_v51, %v1068_v52  ;;  %v4113_v51 = vld [vmem:[%s5114_s24 + $0x98] sm:$0xff]   ;;  %v4116_v52 = vld [vmem:[%s5114_s24 + $0x90] sm:$0xff]  }
 0x2eb   :  { %v1072_v54 = vadd.f32 1e-05, %v1069_v53  ;;  %v4117_v53 = vld [vmem:[%s5114_s24 + $0x48] sm:$0xff]  }
 0x2ed   :  { %4171 = vrsqrt.f32 %v1072_v54  ;;  %v4118_v54 = vld [vmem:[%s5114_s24 + $0x8] sm:$0xff]  }
 0x2fa   :  { %v4172_v57 = vpop.eup %4171 }
 0x2fb   :  { %v1075_v59 = vmul.f32 %v4172_v57, %v1071_v55  ;;  %v1074_v60 = vmul.f32 %v4172_v57, %v1070_v56  ;;  %v4119_v55 = vld [vmem:[%s5114_s24 + $0x88] sm:$0xff]   ;;  %v4120_v56 = vld [vmem:[%s5114_s24 + $0x40] sm:$0xff]  }
 0x2fc   :  { %v4121_v57 = vld [vmem:[%s5114_s24] sm:$0xff]  }
 0x2fd   :  { %v1083_v62 = vmul.f32 %v3301_v58, %v1074_v60  ;;  %v1084_v63 = vmul.f32 %v3301_v58, %v1075_v59  ;;  %v4122_v58 = vld [vmem:[%s5114_s24 + $0x80] sm:$0xff]  }
 0x2ff   :  { %v1092_v0 = vadd.f32 %v3302_v61, %v1083_v62  ;;  %v1093_v1 = vadd.f32 %v3302_v61, %v1084_v63 }
 0x301   :  { %v1094_v2 = vpack.c.bf16 %v1093_v1, %v1092_v0 }
 0x303   :  { %3777 = vmatmul.mubr.bf16.vlgmr.msra.gmra.mxu0 %v1094_v2 }
 0x304   :  { %3798 = vmatprep.mubr.msk.f32.mxu0 %vm4670_vm1, %v4669_v16 }
 0x3c3   :  { %v1193_v3 = vpop.f32.mrf.mxu0 }
 0x3c4   :  { %v1202_v6 = vmul.f32 0.2, %v1193_v3  ;;  %vm1200_vm3 = vcmp.ge.f32.partialorder %v1193_v3, 0.0 }
 0x3c5   :  { %v3778_v4 = vpop.f32.mrf.mxu0 }
 0x3c6   :  { %v1204_v11 = vsel %vm1200_vm3, %v1193_v3, %v1202_v6  ;;  %v1825_v6 = vld [vmem:[#allocation19] sm:$0xff] }
 0x3c7   :  { %v1196_v5 = vpop.f32.mrf.mxu0 }
 0x3c8   :  { %vm1201_vm2 = vcmp.ge.f32.partialorder %v1196_v5, 0.0  ;;  %v1203_v7 = vmul.f32 0.2, %v1196_v5 }
 0x3c9   :  { %v3779_v8 = vpop.f32.mrf.mxu0 }
 0x3ca   :  { %v1205_v9 = vsel %vm1201_vm2, %v1196_v5, %v1203_v7  ;;  %v4123_v7 = vld [vmem:[#allocation21 + $0x78] sm:$0xff]  }
 0x3cb   :  { %3781 = vmatpush3.msra.mxu1 %v1205_v9  ;;  %3795 = vmatpush3.msra.mxu0 %v1205_v9  ;;  %v4124_v8 = vld [vmem:[#allocation21 + $0x38] sm:$0xff]  }
 0x3cc   :  { %3782 = vmatprep.subr.mxu1 %v4669_v16  ;;  %3796 = vmatprep.subr.mxu0 %v4669_v16 }
 0x3cd   :  { %3783 = vmatpush3.msra.mxu1 %v1204_v11  ;;  %3797 = vmatpush3.msra.mxu0 %v1204_v11 }
 0x3ce   :  { %3785 = vmatmul.mubr.msk.f32.vlgmr.msra.gmra.mxu1 %vm1207_vm4, %v1206_v10  ;;  %3787 = vmatprep.subr.mxu1 %v4669_v16  ;;  %v4127_v10 = vld [vmem:[#allocation21 + $0x30] sm:$0xff]  }
 0x3cf   :  { %3788 = vmatpush3.msra.mxu1 %v1205_v9  ;;  %3791 = vmatprep.mubr.msk.f32.mxu1 %vm4670_vm1, %v4669_v16  ;;  %v4125_v9 = vld [vmem:[#allocation21 + $0x70] sm:$0xff]  }
 0x3d0   :  { %3789 = vmatprep.subr.mxu1 %v4669_v16  ;;  %3799 = vmatmul.mubr.msk.f32.vlgmr.msra.gmra.mxu0 %vm1207_vm4, %v1355_v12  ;;  %v4130_v12 = vld [vmem:[#allocation21 + $0x28] sm:$0xff]  }
 0x3d1   :  { %3790 = vmatpush3.msra.mxu1 %v1204_v11  ;;  %3511 = vmatprep.subr.bf16.mxu0 %v4099_v13  ;;  %v4128_v11 = vld [vmem:[#allocation21 + $0x68] sm:$0xff]   ;;  %v4131_v13 = vld [vmem:[#allocation21 + $0x60] sm:$0xff]  }
 0x3d2   :  { %3792 = vmatmul.mubr.msk.f32.vlgmr.msra.gmra.mxu1 %vm1207_vm4, %v1281_v15  ;;  %3801 = vmatprep.subr.mxu1 %v4669_v16  ;;  %v4133_v15 = vld [vmem:[#allocation21 + $0x20] sm:$0xff]  }
 0x3d3   :  { %3802 = vmatpush3.msra.mxu1 %v1496_v17  ;;  %3833 = vmatprep.mubr.msk.f32.mxu1 %vm4670_vm1, %v4669_v16  ;;  %v4134_v17 = vld [vmem:[#allocation21 + $0x58] sm:$0xff]  }
 0x3d4   :  { %3803 = vmatprep.subr.mxu1 %v4669_v16  ;;  %3512 = vmatpush3.bf16.msra.mxu0 %v4100_v18  ;;  %v4136_v18 = vld [vmem:[#allocation21 + $0x18] sm:$0xff]  }
 0x3d5   :  { %3804 = vmatpush3.msra.mxu1 %v1495_v20  ;;  %3513 = vmatprep.subr.bf16.mxu0 %v4102_v19  ;;  %v4137_v19 = vld [vmem:[#allocation21 + $0x50] sm:$0xff]  }
 0x3d6   :  { %3805 = vmatprep.subr.mxu1 %v4669_v16  ;;  %v4139_v20 = vld [vmem:[#allocation21 + $0x10] sm:$0xff]  }
 0x3d7   :  { %3806 = vmatpush3.msra.mxu1 %v1494_v21  ;;  %v3314_v21 = vld [vmem:[#allocation18] ss:$0 sm:$0xff] }
 0x3d8   :  { %3807 = vmatprep.subr.mxu1 %v4669_v16  ;;  %3514 = vmatpush3.bf16.msra.mxu0 %v4103_v23 }
 0x3d9   :  { %3808 = vmatpush3.msra.mxu1 %v1493_v26  ;;  %3515 = vmatprep.subr.bf16.mxu0 %v4105_v24 }
 0x3da   :  { %3809 = vmatprep.subr.mxu1 %v4669_v16 }
 0x3db   :  { %3810 = vmatpush3.msra.mxu1 %v1492_v27 }
 0x3dc   :  { %3811 = vmatprep.subr.mxu1 %v4669_v16  ;;  %3516 = vmatpush3.bf16.msra.mxu0 %v4106_v28 }
 0x3dd   :  { %3812 = vmatpush3.msra.mxu1 %v1491_v30  ;;  %3517 = vmatprep.subr.bf16.mxu0 %v4108_v29 }
 0x3de   :  { %3813 = vmatprep.subr.mxu1 %v4669_v16 }
 0x3df   :  { %3814 = vmatpush3.msra.mxu1 %v1490_v31  ;;  %v3315_v31 = vld [vmem:[#allocation15] ss:$0 sm:$0xff] }
 0x3e0   :  { %3815 = vmatprep.subr.mxu1 %v4669_v16  ;;  %3518 = vmatpush3.bf16.msra.mxu0 %v4109_v32 }
 0x3e1   :  { %3816 = vmatpush3.msra.mxu1 %v1489_v34  ;;  %3519 = vmatprep.subr.bf16.mxu0 %v4111_v33 }
 0x3e2   :  { %3817 = vmatprep.subr.mxu1 %v4669_v16 }
 0x3e3   :  { %3818 = vmatpush3.msra.mxu1 %v1488_v35 }
 0x3e4   :  { %3819 = vmatprep.subr.mxu1 %v4669_v16  ;;  %3520 = vmatpush3.bf16.msra.mxu0 %v4112_v36 }
 0x3e5   :  { %3820 = vmatpush3.msra.mxu1 %v1487_v38  ;;  %3521 = vmatprep.subr.bf16.mxu0 %v4114_v37 }
 0x3e6   :  { %3821 = vmatprep.subr.mxu1 %v4669_v16 }
 0x3e7   :  { %3822 = vmatpush3.msra.mxu1 %v1486_v39 }
 0x3e8   :  { %3823 = vmatprep.subr.mxu1 %v4669_v16  ;;  %3522 = vmatpush3.bf16.msra.mxu0 %v4115_v40 }
 0x3e9   :  { %3824 = vmatpush3.msra.mxu1 %v1485_v41  ;;  %3523 = vmatprep.subr.bf16.mxu0 %v4117_v53  ;;  %v2138_v53 = vld [vmem:[#allocation24 + $0x58] sm:$0xff] }
 0x3ea   :  { %3825 = vmatprep.subr.mxu1 %v4669_v16 }
 0x3eb   :  { %3826 = vmatpush3.msra.mxu1 %v1484_v42 }
 0x3ec   :  { %3827 = vmatprep.subr.mxu1 %v4669_v16  ;;  %3524 = vmatpush3.bf16.msra.mxu0 %v4118_v54  ;;  %v2137_v54 = vld [vmem:[#allocation24 + $0x50] sm:$0xff] }
 0x3ed   :  { %3828 = vmatpush3.msra.mxu1 %v1483_v43  ;;  %3525 = vmatprep.subr.bf16.mxu0 %v4120_v56  ;;  %v2135_v56 = vld [vmem:[#allocation24 + $0x40] sm:$0xff] }
 0x3ee   :  { %3829 = vmatprep.subr.mxu1 %v4669_v16 }
 0x3ef   :  { %3830 = vmatpush3.msra.mxu1 %v1482_v44 }
 0x3f0   :  { %3831 = vmatprep.subr.mxu1 %v4669_v16  ;;  %3526 = vmatpush3.bf16.msra.mxu0 %v4121_v57  ;;  %v2134_v57 = vld [vmem:[#allocation24 + $0x38] sm:$0xff] }
 0x3f1   :  { %3832 = vmatpush3.msra.mxu1 %v1481_v45  ;;  %v1826_v45 = vld [vmem:[#allocation19 + $0x8] sm:$0xff] }
 0x3f2   :  { %3836 = vmatprep.subr.bf16.mxu1 %v4669_v16  ;;  %3834 = vmatmul.mubr.f32.vlgmr.msra.gmra.mxu1 %v1480_v46  ;;  %v1909_v46 = vld [vmem:[#allocation19 + $0x10] sm:$0xff] }
 0x3f3   :  { %3837 = vmatpush3.bf16.msra.mxu1 %v4101_v47  ;;  %3852 = vmatprep.mubr.msk.bf16.mxu1 %vm4670_vm1, %v4669_v16  ;;  %v1992_v47 = vld [vmem:[#allocation19 + $0x20] sm:$0xff] }
 0x3f4   :  { %3838 = vmatprep.subr.bf16.mxu1 %v4669_v16 }
 0x3f7   :  { %3839 = vmatpush3.bf16.msra.mxu1 %v4104_v48  ;;  %v1993_v48 = vld [vmem:[#allocation19 + $0x28] sm:$0xff] }
 0x3f8   :  { %3840 = vmatprep.subr.bf16.mxu1 %v4669_v16 }
 0x3fb   :  { %3841 = vmatpush3.bf16.msra.mxu1 %v4107_v49  ;;  %v2142_v49 = vld [vmem:[#allocation24 + $0x78] sm:$0xff] }
 0x3fc   :  { %3842 = vmatprep.subr.bf16.mxu1 %v4669_v16 }
 0x3ff   :  { %3843 = vmatpush3.bf16.msra.mxu1 %v4110_v50  ;;  %v2141_v50 = vld [vmem:[#allocation24 + $0x70] sm:$0xff] }
 0x400   :  { %3844 = vmatprep.subr.bf16.mxu1 %v4669_v16 }
 0x403   :  { %3845 = vmatpush3.bf16.msra.mxu1 %v4113_v51  ;;  %v2140_v51 = vld [vmem:[#allocation24 + $0x68] sm:$0xff] }
 0x404   :  { %3846 = vmatprep.subr.bf16.mxu1 %v4669_v16 }
 0x407   :  { %3847 = vmatpush3.bf16.msra.mxu1 %v4116_v52  ;;  %v2139_v52 = vld [vmem:[#allocation24 + $0x60] sm:$0xff] }
 0x408   :  { %3848 = vmatprep.subr.bf16.mxu1 %v4669_v16 }
 0x40b   :  { %3849 = vmatpush3.bf16.msra.mxu1 %v4119_v55  ;;  %v2136_v55 = vld [vmem:[#allocation24 + $0x48] sm:$0xff] }
 0x40c   :  { %3850 = vmatprep.subr.bf16.mxu1 %v4669_v16 }
 0x40f   :  { %3851 = vmatpush3.bf16.msra.mxu1 %v4122_v58  ;;  %v2133_v58 = vld [vmem:[#allocation24 + $0x30] sm:$0xff] }
 0x410   :  { %3568 = vmatprep.subr.bf16.mxu1 %v4123_v7  ;;  %v4140_v7 = vld [vmem:[#allocation21 + $0x48] sm:$0xff]  }
 0x48e   :  { %v1277_v59 = vpop.f32.mrf.mxu1 }
 0x48f   :  { %v1429_v2 = vpack.c.bf16 %v1277_v59, %v1277_v59  ;;  %v2132_v59 = vld [vmem:[#allocation24 + $0x28] sm:$0xff] }
 0x490   :  { %v3786_v60 = vpop.f32.mrf.mxu1  ;;  %v1425_v61 = vpop.f32.mrf.mxu0 }
 0x491   :  { %v1431_v62 = vpack.c.bf16 %v1425_v61, %v1425_v61  ;;  %v2131_v60 = vld [vmem:[#allocation24 + $0x20] sm:$0xff]  ;;  %v2130_v61 = vld [vmem:[#allocation24 + $0x18] sm:$0xff] }
 0x492   :  { %v1351_v63 = vpop.f32.mrf.mxu1  ;;  %v3800_v0 = vpop.f32.mrf.mxu0 }
 0x493   :  { %v1430_v1 = vpack.c.bf16 %v1351_v63, %v1351_v63  ;;  %3853 = vmatmul.mubr.bf16.vlgmr.msra.gmra.mxu1 %v1431_v62  ;;  %v2129_v62 = vld [vmem:[#allocation24 + $0x10] sm:$0xff]  ;;  %v2128_v63 = vld [vmem:[#allocation24 + $0x8] sm:$0xff]  ;;  %v2127_v0 = vld [vmem:[#allocation24] sm:$0xff] }
 0x494   :  { %v3793_v3 = vpop.f32.mrf.mxu1  ;;  %3569 = vmatpush3.bf16.msra.mxu1 %v4124_v8  ;;  %v4141_v8 = vld [vmem:[#allocation21 + $0x90] sm:$0xff]  }
 0x495   :  { %1772 = vmatprep.mubr.bf16.mxu0 %v1430_v1  ;;  %3570 = vmatprep.subr.bf16.mxu1 %v4125_v9  ;;  %v4129_v3 = vld [vmem:[#allocation21 + $0xb0] sm:$0xff]   ;;  %v4142_v9 = vld [vmem:[#allocation21 + $0x8] sm:$0xff]  }
 0x496   :  { %1773 = vmatmul.mubr.bf16.vlgmr.msra.gmra.mxu0 %v1429_v2  ;;  %v4126_v2 = vld [vmem:[#allocation21 + $0xb8] sm:$0xff]  }
 0x497   :  { %3858 = vmatprep.mubr.msk.f32.mxu0 %vm1827_vm5, %v1825_v6  ;;  %v4138_v6 = vld [vmem:[#allocation21 + $0x98] sm:$0xff]  }
 0x498   :  { %3571 = vmatpush3.bf16.msra.mxu1 %v4127_v10  ;;  %v4143_v10 = vld [vmem:[#allocation21 + $0x40] sm:$0xff]  }
 0x499   :  { %3572 = vmatprep.subr.bf16.mxu1 %v4128_v11  ;;  %v4144_v11 = vld [vmem:[#allocation21 + $0x88] sm:$0xff]  }
 0x49c   :  { %3573 = vmatpush3.bf16.msra.mxu1 %v4130_v12  ;;  %v4145_v12 = vld [vmem:[#allocation21] sm:$0xff]  }
 0x49d   :  { %3574 = vmatprep.subr.bf16.mxu1 %v4131_v13  ;;  %v4146_v13 = vld [vmem:[#allocation21 + $0x80] sm:$0xff]  }
 0x4a0   :  { %3575 = vmatpush3.bf16.msra.mxu1 %v4133_v15 }
 0x4a1   :  { %3576 = vmatprep.subr.bf16.mxu1 %v4134_v17 }
 0x4a4   :  { %3577 = vmatpush3.bf16.msra.mxu1 %v4136_v18 }
 0x4a5   :  { %3578 = vmatprep.subr.bf16.mxu1 %v4137_v19 }
 0x4a8   :  { %3579 = vmatpush3.bf16.msra.mxu1 %v4139_v20 }
 0x4a9   :  { %3580 = vmatprep.subr.bf16.mxu1 %v4140_v7 }
 0x4ac   :  { %3581 = vmatpush3.bf16.msra.mxu1 %v4142_v9  ;;  %v2475_v9 = vld [vmem:[#allocation27 + $0x8] sm:$0xff] }
 0x4ad   :  { %3582 = vmatprep.subr.bf16.mxu1 %v4143_v10  ;;  %v2476_v10 = vld [vmem:[#allocation27 + $0x10] sm:$0xff] }
 0x4b0   :  { %3583 = vmatpush3.bf16.msra.mxu1 %v4145_v12  ;;  %v2575_v12 = vld [vmem:[#allocation27 + $0x20] sm:$0xff] }
 0x4b2   :  { %v1570_v4 = vpop.f32.mrf.mxu1 }
 0x4b3   :  { %v1571_v23 = vadd.f32 %v3314_v21, %v1570_v4  ;;  %v4132_v4 = vld [vmem:[#allocation21 + $0xa8] sm:$0xff]  }
 0x4b4   :  { %v3835_v5 = vpop.f32.mrf.mxu1 }
 0x4b5   :  { %v1574_v24 = vmul.f32 0.01, %v1571_v23  ;;  %v4135_v5 = vld [vmem:[#allocation21 + $0xa0] sm:$0xff]  }
 0x4b7   :  { %v1580_v29 = vrot.slane %v1574_v24, %v4940_v22  ;;  %v1587_v35 = vrot.slane %v1574_v24, %v4943_v25 }
 0x4b9   :  { %v1581_v37 = vsel %vm1575_vm6, %v1580_v29, 0.0  ;;  %v2474_v29 = vld [vmem:[#allocation27] sm:$0xff] }
 0x4ba   :  { %v1588_v41 = vsel %vm1582_vm7, %v1587_v35, %v1581_v37  ;;  %v2842_v35 = vld [vmem:[#allocation31 + $0x50] sm:$0xff]  ;;  %v2840_v37 = vld [vmem:[#allocation31 + $0x40] sm:$0xff] }
 0x553   :  { %v1814_v26 = vpop.f32.mrf.mxu1 }
 0x555   :  { %v3854_v27 = vpop.f32.mrf.mxu1 }
 0x556   :  { %v3527_v28 = vpop.f32.mrf.mxu0 }
 0x557   :  { %v1817_v30 = vpop.f32.mrf.mxu1 }
 0x558   :  { %v3528_v32 = vpop.f32.mrf.mxu0  ;;  %v2847_v30 = vld [vmem:[#allocation31 + $0x78] sm:$0xff] }
 0x559   :  { %v3529_v33 = vadd.f32 %v3528_v32, %v3527_v28  ;;  %v3855_v34 = vpop.f32.mrf.mxu1  ;;  %v2845_v32 = vld [vmem:[#allocation31 + $0x68] sm:$0xff] }
 0x55a   :  { %v3530_v36 = vpop.f32.mrf.mxu0  ;;  %v2843_v34 = vld [vmem:[#allocation31 + $0x58] sm:$0xff] }
 0x55b   :  { %v1775_v38 = vadd.f32 %v3529_v33, %v3315_v31  ;;  %v2846_v31 = vld [vmem:[#allocation31 + $0x70] sm:$0xff]  ;;  %v2844_v33 = vld [vmem:[#allocation31 + $0x60] sm:$0xff]  ;;  %v2841_v36 = vld [vmem:[#allocation31 + $0x48] sm:$0xff] }
 0x55c   :  { %v3531_v39 = vpop.f32.mrf.mxu0 }
 0x55d   :  { %v1815_v40 = vadd.f32 %v1814_v26, %v1775_v38  ;;  %v2839_v38 = vld [vmem:[#allocation31 + $0x38] sm:$0xff]  ;;  %v2838_v39 = vld [vmem:[#allocation31 + $0x30] sm:$0xff] }
 0x55f   :  { %v1820_v42 = vadd.f32 %v1815_v40, %v1588_v41  ;;  %v2837_v40 = vld [vmem:[#allocation31 + $0x28] sm:$0xff]  ;;  %v2836_v41 = vld [vmem:[#allocation31 + $0x20] sm:$0xff] }
 0x561   :  { %vm1821_vm8 = vcmp.ge.f32.partialorder %v1820_v42, 0.0  ;;  %v1822_v43 = vmul.f32 0.2, %v1820_v42 }
 0x563   :  { %v1823_v44 = vsel %vm1821_vm8, %v1820_v42, %v1822_v43  ;;  %v2835_v42 = vld [vmem:[#allocation31 + $0x18] sm:$0xff]  ;;  %v2834_v43 = vld [vmem:[#allocation31 + $0x10] sm:$0xff] }
 0x564   :  { %1824 = vst [vmem:[%s4819_s4] sm:$0xff] %v1823_v44  ;;  %3856 = vmatprep.subr.mxu0 %v1823_v44  ;;  %s5116_s4 = sld [smem:[#allocation54_spill]] }
 0x565   :  { %3857 = vmatpush3.msra.mxu0 %v1823_v44 }
 0x566   :  { %3859 = vmatmul.mubr.msk.f32.vlgmr.msra.gmra.mxu0 %vm1827_vm5, %v1826_v45  ;;  %3861 = vmatprep.subr.mxu0 %v1823_v44  ;;  %v2832_v45 = vld [vmem:[#allocation31] sm:$0xff] }
 0x567   :  { %3862 = vmatpush3.msra.mxu0 %v1823_v44  ;;  %3863 = vmatprep.mubr.msk.f32.mxu0 %vm1827_vm5, %v1909_v46  ;;  %v4153_v46 = vld [vmem:[#allocation28 + $0xb8] sm:$0xff]  }
 0x568   :  { %3866 = vmatprep.subr.mxu0 %v1823_v44 }
 0x56a   :  { %3864 = vmatmul.mubr.msk.f32.vlgmr.msra.gmra.mxu0 %vm1827_vm5, %v1910_v14  ;;  %v2126_v1 = vld [vmem:[%s5116_s4] sm:$0x3] }
 0x56b   :  { %3867 = vmatpush3.msra.mxu0 %v1823_v44  ;;  %3868 = vmatprep.mubr.msk.f32.mxu0 %vm1827_vm5, %v1992_v47  ;;  %v2833_v44 = vld [vmem:[#allocation31 + $0x8] sm:$0xff]  ;;  %v2831_v14 = vld [vmem:[%s4814_s12] sm:$0x3] }
 0x56c   :  { %3871 = vmatprep.subr.mxu0 %v4669_v16  ;;  %v4156_v47 = vld [vmem:[#allocation28 + $0xb0] sm:$0xff]  }
 0x56e   :  { %3869 = vmatmul.mubr.msk.f32.vlgmr.msra.gmra.mxu0 %vm1827_vm5, %v1993_v48  ;;  %v3346_v48 = vld [vmem:[#allocation25] ss:$0 sm:$0xff] }
 0x56f   :  { %3872 = vmatpush3.msra.mxu0 %v2142_v49  ;;  %3903 = vmatprep.mubr.msk.f32.mxu0 %vm4670_vm1, %v4669_v16 }
 0x570   :  { %3873 = vmatprep.subr.mxu0 %v4669_v16 }
 0x571   :  { %3874 = vmatpush3.msra.mxu0 %v2141_v50 }
 0x572   :  { %3875 = vmatprep.subr.mxu0 %v4669_v16 }
 0x573   :  { %3876 = vmatpush3.msra.mxu0 %v2140_v51 }
 0x574   :  { %3877 = vmatprep.subr.mxu0 %v4669_v16 }
 0x575   :  { %3878 = vmatpush3.msra.mxu0 %v2139_v52  ;;  %v3347_v52 = vld [vmem:[#allocation22] ss:$0 sm:$0xff] }
 0x576   :  { %3879 = vmatprep.subr.mxu0 %v4669_v16 }
 0x577   :  { %3880 = vmatpush3.msra.mxu0 %v2138_v53 }
 0x578   :  { %3881 = vmatprep.subr.mxu0 %v4669_v16 }
 0x579   :  { %3882 = vmatpush3.msra.mxu0 %v2137_v54 }
 0x57a   :  { %3883 = vmatprep.subr.mxu0 %v4669_v16 }
 0x57b   :  { %3884 = vmatpush3.msra.mxu0 %v2136_v55 }
 0x57c   :  { %3885 = vmatprep.subr.mxu0 %v4669_v16 }
 0x57d   :  { %3886 = vmatpush3.msra.mxu0 %v2135_v56 }
 0x57e   :  { %3887 = vmatprep.subr.mxu0 %v4669_v16 }
 0x57f   :  { %3888 = vmatpush3.msra.mxu0 %v2134_v57 }
 0x580   :  { %3889 = vmatprep.subr.mxu0 %v4669_v16 }
 0x581   :  { %3890 = vmatpush3.msra.mxu0 %v2133_v58 }
 0x582   :  { %3891 = vmatprep.subr.mxu0 %v4669_v16 }
 0x583   :  { %3892 = vmatpush3.msra.mxu0 %v2132_v59 }
 0x584   :  { %3893 = vmatprep.subr.mxu0 %v4669_v16 }
 0x585   :  { %3894 = vmatpush3.msra.mxu0 %v2131_v60 }
 0x586   :  { %3895 = vmatprep.subr.mxu0 %v4669_v16 }
 0x587   :  { %3896 = vmatpush3.msra.mxu0 %v2130_v61 }
 0x588   :  { %3897 = vmatprep.subr.mxu0 %v4669_v16 }
 0x589   :  { %3898 = vmatpush3.msra.mxu0 %v2129_v62 }
 0x58a   :  { %3899 = vmatprep.subr.mxu0 %v4669_v16 }
 0x58b   :  { %3900 = vmatpush3.msra.mxu0 %v2128_v63 }
 0x58c   :  { %3901 = vmatprep.subr.mxu0 %v4669_v16 }
 0x58d   :  { %3902 = vmatpush3.msra.mxu0 %v2127_v0 }
 0x58e   :  { %3906 = vmatprep.subr.bf16.mxu0 %v4669_v16  ;;  %3904 = vmatmul.mubr.f32.vlgmr.msra.gmra.mxu0 %v2126_v1 }
 0x58f   :  { %3907 = vmatpush3.bf16.msra.mxu0 %v4126_v2  ;;  %3922 = vmatprep.mubr.msk.bf16.mxu0 %vm4670_vm1, %v4669_v16 }
 0x590   :  { %3908 = vmatprep.subr.bf16.mxu0 %v4669_v16 }
 0x593   :  { %3909 = vmatpush3.bf16.msra.mxu0 %v4129_v3 }
 0x594   :  { %3910 = vmatprep.subr.bf16.mxu0 %v4669_v16 }
 0x597   :  { %3911 = vmatpush3.bf16.msra.mxu0 %v4132_v4 }
 0x598   :  { %3912 = vmatprep.subr.bf16.mxu0 %v4669_v16 }
 0x59b   :  { %3913 = vmatpush3.bf16.msra.mxu0 %v4135_v5 }
 0x59c   :  { %3914 = vmatprep.subr.bf16.mxu0 %v4669_v16 }
 0x59f   :  { %3915 = vmatpush3.bf16.msra.mxu0 %v4138_v6 }
 0x5a0   :  { %3916 = vmatprep.subr.bf16.mxu0 %v4669_v16 }
 0x5a3   :  { %3917 = vmatpush3.bf16.msra.mxu0 %v4141_v8 }
 0x5a4   :  { %3918 = vmatprep.subr.bf16.mxu0 %v4669_v16 }
 0x5a7   :  { %3919 = vmatpush3.bf16.msra.mxu0 %v4144_v11  ;;  %v2477_v11 = vld [vmem:[#allocation27 + $0x18] sm:$0xff] }
 0x5a8   :  { %3920 = vmatprep.subr.bf16.mxu0 %v4669_v16 }
 0x5ab   :  { %3921 = vmatpush3.bf16.msra.mxu0 %v4146_v13  ;;  %v2576_v13 = vld [vmem:[#allocation27 + $0x28] sm:$0xff] }
 0x5ac   :  { %3956 = vmatprep.subr.mxu0 %v4669_v16 }
 0x626   :  { %v3860_v15 = vpop.f32.mrf.mxu0 }
 0x628   :  { %v1900_v17 = vpop.f32.mrf.mxu0 }
 0x629   :  { %v2075_v21 = vpack.c.bf16 %v3860_v15, %v1900_v17  ;;  %v2577_v15 = vld [vmem:[#allocation27 + $0x30] sm:$0xff]  ;;  %v4147_v17 = vld [vmem:[#allocation28 + $0x78] sm:$0xff]  }
 0x62a   :  { %v3865_v18 = vpop.f32.mrf.mxu0 }
 0x62c   :  { %v1983_v19 = vpop.f32.mrf.mxu0 }
 0x62d   :  { %v2076_v20 = vpack.c.bf16 %v3865_v18, %v1983_v19  ;;  %v2578_v18 = vld [vmem:[#allocation27 + $0x38] sm:$0xff]  ;;  %v2676_v19 = vld [vmem:[#allocation27 + $0x40] sm:$0xff] }
 0x62e   :  { %v3870_v23 = vpop.f32.mrf.mxu0 }
 0x62f   :  { %2416 = vmatprep.mubr.bf16.mxu1 %v2076_v20  ;;  %v2677_v20 = vld [vmem:[#allocation27 + $0x48] sm:$0xff] }
 0x630   :  { %v2066_v24 = vpop.f32.mrf.mxu0  ;;  %2417 = vmatmul.mubr.bf16.vlgmr.msra.gmra.mxu1 %v2075_v21  ;;  %v4148_v21 = vld [vmem:[#allocation28 + $0x38] sm:$0xff]  }
 0x631   :  { %v2077_v26 = vpack.c.bf16 %v3870_v23, %v2066_v24  ;;  %3930 = vmatprep.mubr.msk.f32.mxu1 %vm1207_vm4, %v2474_v29  ;;  %v2678_v23 = vld [vmem:[#allocation27 + $0x50] sm:$0xff]  ;;  %v4152_v29 = vld [vmem:[#allocation28 + $0x28] sm:$0xff]  }
 0x632   :  { %v4149_v24 = vld [vmem:[#allocation28 + $0x70] sm:$0xff]  }
 0x633   :  { %3923 = vmatmul.mubr.bf16.vlgmr.msra.gmra.mxu0 %v2077_v26  ;;  %v2679_v26 = vld [vmem:[#allocation27 + $0x58] sm:$0xff] }
 0x634   :  { %3988 = vmatprep.mubr.msk.f32.mxu0 %vm4670_vm1, %v4669_v16  ;;  %3957 = vmatpush3.msra.mxu0 %v2847_v30  ;;  %v4154_v30 = vld [vmem:[#allocation28 + $0x60] sm:$0xff]  }
 0x635   :  { %3958 = vmatprep.subr.mxu0 %v4669_v16 }
 0x636   :  { %3959 = vmatpush3.msra.mxu0 %v2846_v31  ;;  %v4155_v31 = vld [vmem:[#allocation28 + $0x20] sm:$0xff]  }
 0x637   :  { %3960 = vmatprep.subr.mxu0 %v4669_v16 }
 0x638   :  { %3961 = vmatpush3.msra.mxu0 %v2845_v32  ;;  %v4157_v32 = vld [vmem:[#allocation28 + $0x58] sm:$0xff]  }
 0x639   :  { %3962 = vmatprep.subr.mxu0 %v4669_v16 }
 0x63a   :  { %3963 = vmatpush3.msra.mxu0 %v2844_v33  ;;  %v4158_v33 = vld [vmem:[#allocation28 + $0x18] sm:$0xff]  }
 0x63b   :  { %3964 = vmatprep.subr.mxu0 %v4669_v16 }
 0x63c   :  { %3965 = vmatpush3.msra.mxu0 %v2843_v34  ;;  %v4159_v34 = vld [vmem:[#allocation28 + $0xa8] sm:$0xff]  }
 0x63d   :  { %3966 = vmatprep.subr.mxu0 %v4669_v16 }
 0x63e   :  { %3967 = vmatpush3.msra.mxu0 %v2842_v35  ;;  %v4160_v35 = vld [vmem:[#allocation28 + $0x50] sm:$0xff]  }
 0x63f   :  { %3968 = vmatprep.subr.mxu0 %v4669_v16 }
 0x640   :  { %3969 = vmatpush3.msra.mxu0 %v2841_v36  ;;  %v4161_v36 = vld [vmem:[#allocation28 + $0x10] sm:$0xff]  }
 0x641   :  { %3970 = vmatprep.subr.mxu0 %v4669_v16 }
 0x642   :  { %3971 = vmatpush3.msra.mxu0 %v2840_v37  ;;  %v4162_v37 = vld [vmem:[#allocation28 + $0xa0] sm:$0xff]  }
 0x643   :  { %3972 = vmatprep.subr.mxu0 %v4669_v16 }
 0x644   :  { %3973 = vmatpush3.msra.mxu0 %v2839_v38  ;;  %v4163_v38 = vld [vmem:[#allocation28 + $0x48] sm:$0xff]  }
 0x645   :  { %3974 = vmatprep.subr.mxu0 %v4669_v16 }
 0x646   :  { %3975 = vmatpush3.msra.mxu0 %v2838_v39  ;;  %v4164_v39 = vld [vmem:[#allocation28 + $0x8] sm:$0xff]  }
 0x647   :  { %3976 = vmatprep.subr.mxu0 %v4669_v16 }
 0x648   :  { %3977 = vmatpush3.msra.mxu0 %v2837_v40  ;;  %v4165_v40 = vld [vmem:[#allocation28 + $0x98] sm:$0xff]  }
 0x649   :  { %3978 = vmatprep.subr.mxu0 %v4669_v16 }
 0x64a   :  { %3979 = vmatpush3.msra.mxu0 %v2836_v41  ;;  %v4166_v41 = vld [vmem:[#allocation28 + $0x40] sm:$0xff]  }
 0x64b   :  { %3980 = vmatprep.subr.mxu0 %v4669_v16 }
 0x64c   :  { %3981 = vmatpush3.msra.mxu0 %v2835_v42  ;;  %v4167_v42 = vld [vmem:[#allocation28] sm:$0xff]  }
 0x64d   :  { %3982 = vmatprep.subr.mxu0 %v4669_v16 }
 0x64e   :  { %v2216_v27 = vpop.f32.mrf.mxu0  ;;  %3983 = vmatpush3.msra.mxu0 %v2834_v43  ;;  %v4168_v43 = vld [vmem:[#allocation28 + $0x90] sm:$0xff]  }
 0x64f   :  { %3984 = vmatprep.subr.mxu0 %v4669_v16  ;;  %v2217_v50 = vadd.f32 %v3346_v48, %v2216_v27  ;;  %v4150_v27 = vld [vmem:[#allocation28 + $0x30] sm:$0xff]  }
 0x650   :  { %v3905_v28 = vpop.f32.mrf.mxu0  ;;  %3985 = vmatpush3.msra.mxu0 %v2833_v44  ;;  %v4169_v44 = vld [vmem:[#allocation28 + $0x88] sm:$0xff]  }
 0x651   :  { %3986 = vmatprep.subr.mxu0 %v4669_v16  ;;  %v2220_v56 = vmul.f32 0.01, %v2217_v50  ;;  %v4151_v28 = vld [vmem:[#allocation28 + $0x68] sm:$0xff]  }
 0x652   :  { %3987 = vmatpush3.msra.mxu0 %v2832_v45  ;;  %v4170_v45 = vld [vmem:[#allocation28 + $0x80] sm:$0xff]  }
 0x653   :  { %3991 = vmatprep.subr.bf16.mxu0 %v4153_v46  ;;  %3989 = vmatmul.mubr.f32.vlgmr.msra.gmra.mxu0 %v2831_v14  ;;  %v2224_v62 = vrot.slane %v2220_v56, %v4940_v22  ;;  %v2230_v1 = vrot.slane %v2220_v56, %v4943_v25 }
 0x654   :  { %3992 = vmatpush3.bf16.msra.mxu0 %v4153_v46 }
 0x655   :  { %3993 = vmatprep.subr.bf16.mxu0 %v4156_v47 }
 0x658   :  { %3994 = vmatpush3.bf16.msra.mxu0 %v4156_v47 }
 0x659   :  { %3995 = vmatprep.subr.bf16.mxu0 %v4159_v34 }
 0x65c   :  { %3996 = vmatpush3.bf16.msra.mxu0 %v4159_v34 }
 0x65d   :  { %3997 = vmatprep.subr.bf16.mxu0 %v4162_v37 }
 0x660   :  { %3998 = vmatpush3.bf16.msra.mxu0 %v4162_v37 }
 0x661   :  { %3999 = vmatprep.subr.bf16.mxu0 %v4165_v40 }
 0x664   :  { %4000 = vmatpush3.bf16.msra.mxu0 %v4165_v40 }
 0x665   :  { %4001 = vmatprep.subr.bf16.mxu0 %v4168_v43 }
 0x668   :  { %4002 = vmatpush3.bf16.msra.mxu0 %v4168_v43 }
 0x669   :  { %4003 = vmatprep.subr.bf16.mxu0 %v4169_v44 }
 0x66c   :  { %4004 = vmatpush3.bf16.msra.mxu0 %v4169_v44 }
 0x66d   :  { %4005 = vmatprep.subr.bf16.mxu0 %v4170_v45 }
 0x670   :  { %4006 = vmatpush3.bf16.msra.mxu0 %v4170_v45 }
 0x6f0   :  { %v3584_v49 = vpop.f32.mrf.mxu1 }
 0x6f2   :  { %v3585_v51 = vpop.f32.mrf.mxu1 }
 0x6f3   :  { %v3586_v53 = vadd.f32 %v3585_v51, %v3584_v49  ;;  %v2459_v54 = vpop.f32.mrf.mxu0 }
 0x6f4   :  { %v3587_v55 = vpop.f32.mrf.mxu1 }
 0x6f5   :  { %v2419_v57 = vadd.f32 %v3586_v53, %v3347_v52  ;;  %v3924_v58 = vpop.f32.mrf.mxu0 }
 0x6f6   :  { %v3588_v59 = vpop.f32.mrf.mxu1 }
 0x6f7   :  { %v2460_v16 = vadd.f32 %v2459_v54, %v2419_v57  ;;  %v3589_v60 = vadd.f32 %v3588_v59, %v3587_v55  ;;  %v2462_v61 = vpop.f32.mrf.mxu0 }
 0x6f9   :  { %v2422_v63 = vadd.f32 %v3589_v60, %v3347_v52  ;;  %v3925_v0 = vpop.f32.mrf.mxu0  ;;  %v2466_v2 = vadd.f32 %v2460_v16, %v2224_v62 }
 0x6fb   :  { %v2463_v3 = vadd.f32 %v2462_v61, %v2422_v63  ;;  %v2470_v5 = vmul.f32 0.2, %v2466_v2  ;;  %vm2468_vm10 = vcmp.ge.f32.partialorder %v2466_v2, 0.0 }
 0x6fd   :  { %v2467_v4 = vadd.f32 %v2463_v3, %v2230_v1  ;;  %v2472_v8 = vsel %vm2468_vm10, %v2466_v2, %v2470_v5  ;;  %v3384_v2 = vld [vmem:[#allocation33] ss:$0 sm:$0xff] }
 0x6ff   :  { %vm2469_vm9 = vcmp.ge.f32.partialorder %v2467_v4, 0.0  ;;  %v2471_v6 = vmul.f32 0.2, %v2467_v4 }
 0x701   :  { %v2473_v7 = vsel %vm2469_vm9, %v2467_v4, %v2471_v6 }
 0x702   :  { %3926 = vmatprep.subr.mxu1 %v2473_v7 }
 0x703   :  { %3927 = vmatpush3.msra.mxu1 %v2473_v7 }
 0x704   :  { %3928 = vmatprep.subr.mxu1 %v2472_v8 }
 0x705   :  { %3929 = vmatpush3.msra.mxu1 %v2472_v8 }
 0x706   :  { %3931 = vmatmul.mubr.msk.f32.vlgmr.msra.gmra.mxu1 %vm1207_vm4, %v2475_v9  ;;  %3936 = vmatprep.subr.mxu1 %v2473_v7 }
 0x707   :  { %3937 = vmatpush3.msra.mxu1 %v2473_v7  ;;  %3933 = vmatprep.mubr.msk.f32.mxu1 %vm1207_vm4, %v2476_v10 }
 0x708   :  { %3938 = vmatprep.subr.mxu1 %v2472_v8 }
 0x709   :  { %3939 = vmatpush3.msra.mxu1 %v2472_v8 }
 0x70a   :  { %3934 = vmatmul.mubr.msk.f32.gmra.mxu1 %vm1207_vm4, %v2477_v11  ;;  %3946 = vmatprep.subr.mxu1 %v2473_v7 }
 0x70b   :  { %3940 = vmatprep.mubr.msk.f32.mxu1 %vm1207_vm4, %v2575_v12 }
 0x70e   :  { %3941 = vmatmul.mubr.msk.f32.vlgmr.msra.gmra.mxu1 %vm1207_vm4, %v2576_v13 }
 0x70f   :  { %3947 = vmatpush3.msra.mxu1 %v2473_v7  ;;  %3943 = vmatprep.mubr.msk.f32.mxu1 %vm1207_vm4, %v2577_v15 }
 0x710   :  { %3948 = vmatprep.subr.mxu1 %v2472_v8 }
 0x711   :  { %3949 = vmatpush3.msra.mxu1 %v2472_v8  ;;  %v3385_v8 = vld [vmem:[#allocation30] ss:$0 sm:$0xff] }
 0x712   :  { %3944 = vmatmul.mubr.msk.f32.gmra.mxu1 %vm1207_vm4, %v2578_v18  ;;  %3634 = vmatprep.subr.bf16.mxu1 %v4147_v17 }
 0x713   :  { %3950 = vmatprep.mubr.msk.f32.mxu1 %vm1207_vm4, %v2676_v19  ;;  %v2921_v46 = vpop.f32.mrf.mxu0 }
 0x714   :  { %v2922_v4 = vadd.f32 %v3384_v2, %v2921_v46 }
 0x715   :  { %v3990_v14 = vpop.f32.mrf.mxu0 }
 0x716   :  { %3951 = vmatmul.mubr.msk.f32.vlgmr.msra.gmra.mxu1 %vm1207_vm4, %v2677_v20  ;;  %v2925_v9 = vmul.f32 0.01, %v2922_v4 }
 0x717   :  { %3953 = vmatprep.mubr.msk.f32.mxu1 %vm1207_vm4, %v2678_v23  ;;  %3635 = vmatpush3.bf16.msra.mxu1 %v4148_v21 }
 0x718   :  { %3636 = vmatprep.subr.bf16.mxu1 %v4149_v24  ;;  %v2939_v20 = vrot.slane %v2925_v9, %v4940_v22  ;;  %v2959_v24 = vrot.slane %v2925_v9, %v4943_v25 }
 0x71a   :  { %3954 = vmatmul.mubr.msk.f32.gmra.mxu1 %vm1207_vm4, %v2679_v26 }
 0x71b   :  { %3637 = vmatpush3.bf16.msra.mxu1 %v4150_v27 }
 0x71c   :  { %3638 = vmatprep.subr.bf16.mxu1 %v4151_v28 }
 0x71f   :  { %3639 = vmatpush3.bf16.msra.mxu1 %v4152_v29 }
 0x720   :  { %3640 = vmatprep.subr.bf16.mxu1 %v4154_v30 }
 0x723   :  { %3641 = vmatpush3.bf16.msra.mxu1 %v4155_v31 }
 0x724   :  { %3642 = vmatprep.subr.bf16.mxu1 %v4157_v32 }
 0x727   :  { %3643 = vmatpush3.bf16.msra.mxu1 %v4158_v33 }
 0x728   :  { %3644 = vmatprep.subr.bf16.mxu1 %v4160_v35 }
 0x72b   :  { %3645 = vmatpush3.bf16.msra.mxu1 %v4161_v36 }
 0x72c   :  { %3646 = vmatprep.subr.bf16.mxu1 %v4163_v38 }
 0x72f   :  { %3647 = vmatpush3.bf16.msra.mxu1 %v4164_v39 }
 0x730   :  { %3648 = vmatprep.subr.bf16.mxu1 %v4166_v41 }
 0x733   :  { %3649 = vmatpush3.bf16.msra.mxu1 %v4167_v42 }
 0x7c6   :  { %v3932_v47 = vpop.f32.mrf.mxu1 }
 0x7c8   :  { %v2556_v48 = vpop.f32.mrf.mxu1 }
 0x7c9   :  { %v2777_v54 = vpack.c.bf16 %v3932_v47, %v2556_v48 }
 0x7ca   :  { %v3935_v49 = vpop.f32.mrf.mxu1 }
 0x7cc   :  { %v2566_v50 = vpop.f32.mrf.mxu1 }
 0x7cd   :  { %v2780_v60 = vpack.c.bf16 %v3935_v49, %v2566_v50 }
 0x7ce   :  { %v3942_v51 = vpop.f32.mrf.mxu1 }
 0x7d0   :  { %v2657_v52 = vpop.f32.mrf.mxu1 }
 0x7d1   :  { %v2778_v53 = vpack.c.bf16 %v3942_v51, %v2657_v52 }
 0x7d2   :  { %v3945_v55 = vpop.f32.mrf.mxu1 }
 0x7d3   :  { %3147 = vmatprep.mubr.bf16.mxu1 %v2778_v53 }
 0x7d4   :  { %v2667_v56 = vpop.f32.mrf.mxu1  ;;  %3148 = vmatmul.mubr.bf16.vlgmr.msra.gmra.mxu1 %v2777_v54 }
 0x7d5   :  { %v2781_v57 = vpack.c.bf16 %v3945_v55, %v2667_v56 }
 0x7d6   :  { %v3952_v58 = vpop.f32.mrf.mxu1 }
 0x7d7   :  { %3155 = vmatprep.mubr.bf16.mxu1 %v2781_v57 }
 0x7d8   :  { %v2758_v59 = vpop.f32.mrf.mxu1 }
 0x7d9   :  { %v2779_v16 = vpack.c.bf16 %v3952_v58, %v2758_v59 }
 0x7da   :  { %v3955_v61 = vpop.f32.mrf.mxu1 }
 0x7db   :  { %4007 = vmatprep.mubr.bf16.mxu0 %v2779_v16 }
 0x7dc   :  { %v2768_v62 = vpop.f32.mrf.mxu1  ;;  %3156 = vmatmul.mubr.bf16.gmra.mxu1 %v2780_v60 }
 0x7dd   :  { %v2782_v63 = vpack.c.bf16 %v3955_v61, %v2768_v62 }
 0x7df   :  { %4008 = vmatmul.mubr.bf16.vlgmr.msra.gmra.mxu0 %v2782_v63 }
 0x894   :  { %v3650_v0 = vpop.f32.mrf.mxu1 }
 0x896   :  { %v3651_v1 = vpop.f32.mrf.mxu1 }
 0x897   :  { %v3652_v6 = vadd.f32 %v3651_v1, %v3650_v0 }
 0x898   :  { %v3653_v3 = vpop.f32.mrf.mxu1 }
 0x899   :  { %v3150_v17 = vadd.f32 %v3652_v6, %v3385_v8 }
 0x89a   :  { %v3654_v5 = vpop.f32.mrf.mxu1 }
 0x89b   :  { %v3655_v13 = vadd.f32 %v3654_v5, %v3653_v3 }
 0x89c   :  { %v3656_v7 = vpop.f32.mrf.mxu1 }
 0x89d   :  { %v3153_v30 = vadd.f32 %v3655_v13, %v3385_v8 }
 0x89e   :  { %v3657_v10 = vpop.f32.mrf.mxu1 }
 0x89f   :  { %v3658_v11 = vadd.f32 %v3657_v10, %v3656_v7  ;;  %v4009_v12 = vpop.f32.mrf.mxu0 }
 0x8a0   :  { %v3659_v15 = vpop.f32.mrf.mxu1 }
 0x8a1   :  { %v3158_v18 = vadd.f32 %v3658_v11, %v3385_v8  ;;  %v3198_v19 = vpop.f32.mrf.mxu0 }
 0x8a2   :  { %v3199_v21 = vadd.f32 %v3198_v19, %v3150_v17  ;;  %v3660_v23 = vpop.f32.mrf.mxu1 }
 0x8a3   :  { %v3207_v26 = vadd.f32 %v4009_v12, %v3158_v18  ;;  %v3661_v27 = vadd.f32 %v3660_v23, %v3659_v15  ;;  %v4010_v28 = vpop.f32.mrf.mxu0 }
 0x8a4   :  { %v3213_v29 = vadd.f32 %v3199_v21, %v2939_v20 }
 0x8a5   :  { %v3215_v31 = vadd.f32 %v3207_v26, %v2959_v24  ;;  %v3161_v32 = vadd.f32 %v3661_v27, %v3385_v8  ;;  %v3201_v33 = vpop.f32.mrf.mxu0 }
 0x8a6   :  { %3217 = vst [vmem:[%s4824_s30] sm:$0xff] %v3213_v29  ;;  %v3202_v34 = vadd.f32 %v3201_v33, %v3153_v30 }
 0x8a7   :  { %3219 = vst [vmem:[%s4824_s30 + $0x10] sm:$0xff] %v3215_v31  ;;  %v3210_v35 = vadd.f32 %v4010_v28, %v3161_v32 }
 0x8a8   :  { %v3214_v36 = vadd.f32 %v3202_v34, %v2939_v20 }
 0x8a9   :  { %v3216_v22 = vadd.f32 %v3210_v35, %v2959_v24 }
 0x8aa   :  { %3218 = vst [vmem:[%s4824_s30 + $0x8] sm:$0xff] %v3214_v36 }
 0x8ab   :  { %3220 = vst [vmem:[%s4824_s30 + $0x18] sm:$0xff] %v3216_v22 }
 0x8ac   :  { %3229 = vsyncpa [#allocation3], 1 }
 0x8ad   :  { %3230 = vsyncpa [#allocation5], 1 }
 0x8ae   :  { %3231 = vsyncpa [#allocation8], 1 }
 0x8af   :  { %3232 = vsyncpa [#allocation11], 1 }
 0x8b0   :  { %3233 = vsyncpa [#allocation14], 1 }
 0x8b1   :  { %3234 = vsyncpa [#allocation17], 1 }
 0x8b2   :  { %3235 = vsyncpa [#allocation20], 1 }
 0x8b3   :  { %3236 = vsyncpa [#allocation23], 1 }
 0x8b4   :  { %3237 = vsyncpa [#allocation26], 1 }
 0x8b5   :  { %3238 = vsyncpa [#allocation29], 1 }
 0x8b6   :  { %3239 = vsyncpa [#allocation32], 1 }

</bundles_post_ra>
